<compile_context>
chip_gen: v5e
topology: v5e:2x2
jax: 0.10.0
libtpu: 0.0.40
codegen_flags: <defaults>
</compile_context>

<pallas_src>
import functools

import jax
import jax.numpy as jnp
from jax import lax
from jax.experimental import pallas as pl
from jax.experimental.pallas import tpu as pltpu


def _eq_conv_kernel(x_ref, w_ref, b_ref, o_ref, *, ks, stride, dilation,
                    tile_h, out_w, add_bias):
    # x_ref: (H_pad, W, IC)       bf16 whole (padded) image, VMEM-resident across row tiles
    # w_ref: (ks*ks*IC, OC_pad)   bf16, equalised-LR weight multiplier already folded in
    # b_ref: (1, OC_pad)          f32, bias multiplier already folded in
    # o_ref: (tile_m, OC_pad)     bf16 lane-dense output slab for this (n, row-tile)
    _, w_in, ic = x_ref.shape
    t_m, oc_pad = o_ref.shape

    r = pl.program_id(1)
    row_step = tile_h * stride
    row_base = pl.multiple_of(r * row_step, row_step)
    rows_sup = (tile_h - 1) * stride + (ks - 1) * dilation + 1

    # Single load of the row superset; every tap below is a static slice of this value.
    rows_all = x_ref[pl.ds(row_base, rows_sup), :, :]            # (rows_sup, W, IC) bf16

    def tap_rows(kh):
        h0 = kh * dilation
        if stride == 1:
            return lax.slice(rows_all, (h0, 0, 0), (h0 + tile_h, w_in, ic))
        return lax.slice(rows_all, (h0, 0, 0),
                         (h0 + (tile_h - 1) * stride + 1, w_in, ic),
                         strides=(stride, 1, 1))

    def tap_piece(rows, kw):
        c0 = kw * dilation
        if stride == 1:
            return lax.slice(rows, (0, c0, 0), (tile_h, c0 + out_w, ic))
        return lax.slice(rows, (0, c0, 0),
                         (tile_h, c0 + (out_w - 1) * stride + 1, ic),
                         strides=(1, stride, 1))

    if ic < 128:
        # Small IC: fused im2col slab -> a SINGLE MXU matmul with K = ks*ks*IC.
        pieces = []
        for kh in range(ks):
            rows = tap_rows(kh)
            for kw in range(ks):
                pieces.append(tap_piece(rows, kw))               # (tile_h, Wo, IC)
        lhs = jnp.concatenate(pieces, axis=-1).reshape(t_m, ks * ks * ic)
        acc = jnp.dot(lhs, w_ref[...], preferred_element_type=jnp.float32)
    else:
        # Large IC: per-tap matmuls (K = IC each) accumulated in f32 -- avoids
        # materialising the (tile_m, ks*ks*IC) slab; o_ref is written once at the end.
        acc = jnp.zeros((t_m, oc_pad), jnp.float32)
        for kh in range(ks):
            rows = tap_rows(kh)
            for kw in range(ks):
                piece = tap_piece(rows, kw).reshape(t_m, ic)
                w_tap = w_ref[pl.ds((kh * ks + kw) * ic, ic), :]
                acc = acc + jnp.dot(piece, w_tap, preferred_element_type=jnp.float32)

    if add_bias:
        acc = acc + b_ref[...]                                   # (1, OC_pad) broadcast
    o_ref[...] = acc.astype(o_ref.dtype)


def _pick_row_tile(ho, wo, oc_pad, *, budget_bytes=1 << 20):
    """Output rows per grid step.

    Targets an 8-aligned tile_m = tile_h*wo of >= 256 within a ~1 MiB f32 accumulator
    budget.  The wrapper zero-pads the input rows so tile_h need not divide Ho (tail is
    handled by padding, not masking).
    """
    row_bytes = wo * oc_pad * 4
    max_th = max(1, budget_bytes // row_bytes)
    th = min(max(1, -(-256 // wo)), max_th)        # aim for tile_m >= 256
    if th >= ho:
        th = ho                                    # one tile covers every output row
    for cand in range(th, min(th + 8, max_th) + 1):
        if (cand * wo) % 8 == 0:                   # no masked sublane stores
            return cand
    return th


def equalised_conv_forward(x_nchw, weight_oihw, bias, *, stride=1, dilation=1,
                           weight_multiplier=1.0, bias_multiplier=1.0, add_bias=True):
    """Pallas implementation of EqualisedConvLayer.forward (F.conv2d, padding=0)."""
    N, IC, H, W = x_nchw.shape
    OC, IC_w, KS, KS2 = weight_oihw.shape
    assert IC == IC_w and KS == KS2

    Ho = (H - dilation * (KS - 1) - 1) // stride + 1
    Wo = (W - dilation * (KS - 1) - 1) // stride + 1
    assert Ho > 0 and Wo > 0, "input too small for this kernel/stride/dilation"

    OC_pad = ((OC + 127) // 128) * 128
    K = KS * KS * IC

    tile_h = _pick_row_tile(Ho, Wo, OC_pad)
    R = pl.cdiv(Ho, tile_h)
    Ho_pad = R * tile_h
    tile_m = tile_h * Wo
    # Rows of (zero-padded) input the kernel may touch; pad H up so tail tiles never OOB.
    H_use = max(H, (Ho_pad - 1) * stride + dilation * (KS - 1) + 1)

    # ---- parameter / layout prep (tiny one-off XLA ops; bf16 once, scales folded) ------
    x_nhwc = jnp.transpose(x_nchw.astype(jnp.bfloat16), (0, 2, 3, 1))    # NCHW -> NHWC
    if H_use > H:
        x_nhwc = jnp.pad(x_nhwc, ((0, 0), (0, H_use - H), (0, 0), (0, 0)))

    w2d = jnp.transpose(weight_oihw, (2, 3, 1, 0)).reshape(K, OC)        # OIHW -> (K, OC)
    w2d = (w2d * weight_multiplier).astype(jnp.bfloat16)                 # fold eq-LR scale
    if OC_pad != OC:
        w2d = jnp.pad(w2d, ((0, 0), (0, OC_pad - OC)))                   # lane-dense OC

    use_bias = bool(add_bias) and (bias is not None)
    if use_bias:
        b_row = (bias * bias_multiplier).astype(jnp.float32).reshape(1, OC)
        if OC_pad != OC:
            b_row = jnp.pad(b_row, ((0, 0), (0, OC_pad - OC)))
    else:
        b_row = jnp.zeros((1, OC_pad), jnp.float32)

    # ---- VMEM budget: double-buffered blocks + in-kernel temporaries, with headroom ----
    def rup(x, m):
        return ((x + m - 1) // m) * m

    rows_sup = (tile_h - 1) * stride + (KS - 1) * dilation + 1
    img_blk = H_use * rup(W, 16) * rup(IC, 128) * 2          # bf16, lane/sublane padded
    w_blk = rup(K, 16) * OC_pad * 2
    b_blk = 8 * 128 * 4
    out_blk = rup(tile_m, 16) * OC_pad * 2
    slab_k = K if IC < 128 else IC
    temps = (rows_sup * rup(W, 16) * rup(IC, 128) * 2        # row-superset load
             + tile_m * rup(slab_k, 128) * 2                 # im2col slab / tap piece
             + tile_m * OC_pad * 4)                          # f32 accumulator
    need = 2 * (img_blk + w_blk + b_blk + out_blk) + temps
    try:
        phys = pltpu.get_tpu_info().vmem_capacity_bytes
    except Exception:
        phys = 64 << 20                                      # conservative (v7x per-core)
    vmem_limit = max(min(max(2 * need + (4 << 20), 32 << 20), phys - (4 << 20)),
                     need + (2 << 20))

    kernel = functools.partial(
        _eq_conv_kernel, ks=KS, stride=stride, dilation=dilation,
        tile_h=tile_h, out_w=Wo, add_bias=use_bias)

    out4 = pl.pallas_call(
        kernel,
        out_shape=jax.ShapeDtypeStruct((N, R, tile_m, OC_pad), jnp.bfloat16),
        grid_spec=pltpu.PrefetchScalarGridSpec(
            num_scalar_prefetch=0,
            grid=(N, R),
            in_specs=[
                # Whole (padded) image per batch element; block index is constant in r,
                # so it is DMA'd once per n and stays VMEM-resident across row tiles.
                pl.BlockSpec((None, H_use, W, IC), lambda n, r: (n, 0, 0, 0)),
                pl.BlockSpec((K, OC_pad), lambda n, r: (0, 0)),
                pl.BlockSpec((1, OC_pad), lambda n, r: (0, 0)),
            ],
            out_specs=pl.BlockSpec((None, None, tile_m, OC_pad),
                                   lambda n, r: (n, r, 0, 0)),
        ),
        compiler_params=pltpu.CompilerParams(
            dimension_semantics=("parallel", "parallel"),
            vmem_limit_bytes=int(vmem_limit),
        ),
    )(x_nhwc, w2d, b_row)

    # Back to the PyTorch NCHW convention (wrapper glue only).
    out = out4.reshape(N, R * tile_m, OC_pad)[:, :Ho * Wo, :OC]
    out = out.reshape(N, Ho, Wo, OC)
    return jnp.transpose(out, (0, 3, 1, 2)).astype(x_nchw.dtype)


if __name__ == "__main__":
    # Module config (defaults from __init__): ks=3, s=1, d=1, bias=True,
    # init_gain=sqrt(2), weight_scaling=True, custom_lr=1.
    ic, oc, ks, s, d = 4, 8, 3, 1, 1
    custom_lr = 1.0
    param_std = 1.0 / custom_lr                      # weight_scaling=True branch
    weight_multiplier = param_std * custom_lr        # = 1.0
    bias_multiplier = custom_lr                      # = 1.0

    key = jax.random.PRNGKey(0)
    kx, kw, kb = jax.random.split(key, 3)

    weight = jax.random.normal(kw, (oc, ic, ks, ks), jnp.float32) * param_std
    # Module init is zeros; use a nonzero bias so the bias path is actually verified.
    bias = jax.random.normal(kb, (oc,), jnp.float32)

    x = jax.random.normal(kx, (2, ic, 16, 16), jnp.float32)   # NCHW like PyTorch

    out = equalised_conv_forward(
        x, weight, bias, stride=s, dilation=d,
        weight_multiplier=weight_multiplier, bias_multiplier=bias_multiplier,
        add_bias=True)
    out = jax.block_until_ready(out)

    # Reference: f32 conv with the same F.conv2d(padding=0) semantics.
    ref = lax.conv_general_dilated(
        x, weight * weight_multiplier,
        window_strides=(s, s), padding="VALID", rhs_dilation=(d, d),
        dimension_numbers=("NCHW", "OIHW", "NCHW"),
    ) + (bias * bias_multiplier)[None, :, None, None]

    assert out.shape == ref.shape, (out.shape, ref.shape)
    # Kernel I/O is bf16 (f32 MXU accumulation); use a bf16-sized mixed abs/rel tolerance.
    err = jnp.abs(out - ref)
    tol = 2e-1 + 2e-2 * jnp.abs(ref)
    assert bool(jnp.all(err <= tol)), float(jnp.max(err - tol))
    print("KERNEL_OK")
</pallas_src>

<mosaic_0001>
module attributes {stable_mosaic.version = 11 : i64} {
  func.func @_eq_conv_kernel(%arg0: i32, %arg1: i32, %arg2: memref<1x18x16x4xbf16, #tpu.memory_space<vmem>>, %arg3: memref<36x128xbf16, #tpu.memory_space<vmem>>, %arg4: memref<1x128xf32, #tpu.memory_space<vmem>>, %arg5: memref<1x1x224x128xbf16, #tpu.memory_space<vmem>>) attributes {dimension_semantics = [#tpu.dimension_semantics<parallel>, #tpu.dimension_semantics<parallel>], iteration_bounds = array<i64: 2, 1>, scalar_prefetch = 0 : i64, scratch_operands = 0 : i64, tpu.core_type = #tpu.core_type<tc>, window_params = [{transform_indices = @transform_0, window_bounds = array<i64: 1, 18, 16, 4>}, {pipeline_mode = #tpu.pipeline_mode<synchronous>, transform_indices = @transform_1, window_bounds = array<i64: 36, 128>}, {pipeline_mode = #tpu.pipeline_mode<synchronous>, transform_indices = @transform_2, window_bounds = array<i64: 1, 128>}, {transform_indices = @transform_3, window_bounds = array<i64: 1, 1, 224, 128>}]} {
    %c16_i32 = arith.constant 16 : i32
    %0 = arith.muli %arg1, %c16_i32 : i32
    %1 = tpu.assume_multiple %0, 16 : i32
    %c0 = arith.constant 0 : index
    %2 = arith.index_cast %1 : i32 to index
    %c0_0 = arith.constant 0 : index
    %c0_1 = arith.constant 0 : index
    %3 = vector.load %arg2[%c0, %2, %c0_0, %c0_1] : memref<1x18x16x4xbf16, #tpu.memory_space<vmem>>, vector<1x18x16x4xbf16>
    %4 = vector.shape_cast %3 : vector<1x18x16x4xbf16> to vector<18x16x4xbf16>
    %5 = vector.extract_strided_slice %4 {offsets = [0, 0, 0], sizes = [16, 16, 4], strides = [1, 1, 1]} : vector<18x16x4xbf16> to vector<16x16x4xbf16>
    %6 = vector.extract_strided_slice %5 {offsets = [0, 0, 0], sizes = [16, 14, 4], strides = [1, 1, 1]} : vector<16x16x4xbf16> to vector<16x14x4xbf16>
    %7 = vector.extract_strided_slice %5 {offsets = [0, 1, 0], sizes = [16, 14, 4], strides = [1, 1, 1]} : vector<16x16x4xbf16> to vector<16x14x4xbf16>
    %8 = vector.extract_strided_slice %5 {offsets = [0, 2, 0], sizes = [16, 14, 4], strides = [1, 1, 1]} : vector<16x16x4xbf16> to vector<16x14x4xbf16>
    %9 = vector.extract_strided_slice %4 {offsets = [1, 0, 0], sizes = [16, 16, 4], strides = [1, 1, 1]} : vector<18x16x4xbf16> to vector<16x16x4xbf16>
    %10 = vector.extract_strided_slice %9 {offsets = [0, 0, 0], sizes = [16, 14, 4], strides = [1, 1, 1]} : vector<16x16x4xbf16> to vector<16x14x4xbf16>
    %11 = vector.extract_strided_slice %9 {offsets = [0, 1, 0], sizes = [16, 14, 4], strides = [1, 1, 1]} : vector<16x16x4xbf16> to vector<16x14x4xbf16>
    %12 = vector.extract_strided_slice %9 {offsets = [0, 2, 0], sizes = [16, 14, 4], strides = [1, 1, 1]} : vector<16x16x4xbf16> to vector<16x14x4xbf16>
    %13 = vector.extract_strided_slice %4 {offsets = [2, 0, 0], sizes = [16, 16, 4], strides = [1, 1, 1]} : vector<18x16x4xbf16> to vector<16x16x4xbf16>
    %14 = vector.extract_strided_slice %13 {offsets = [0, 0, 0], sizes = [16, 14, 4], strides = [1, 1, 1]} : vector<16x16x4xbf16> to vector<16x14x4xbf16>
    %15 = vector.extract_strided_slice %13 {offsets = [0, 1, 0], sizes = [16, 14, 4], strides = [1, 1, 1]} : vector<16x16x4xbf16> to vector<16x14x4xbf16>
    %16 = vector.extract_strided_slice %13 {offsets = [0, 2, 0], sizes = [16, 14, 4], strides = [1, 1, 1]} : vector<16x16x4xbf16> to vector<16x14x4xbf16>
    %17 = tpu.concatenate %6, %7, %8, %10, %11, %12, %14, %15, %16 in 2 : vector<16x14x4xbf16>, vector<16x14x4xbf16>, vector<16x14x4xbf16>, vector<16x14x4xbf16>, vector<16x14x4xbf16>, vector<16x14x4xbf16>, vector<16x14x4xbf16>, vector<16x14x4xbf16>, vector<16x14x4xbf16> -> vector<16x14x36xbf16>
    %18 = vector.shape_cast %17 : vector<16x14x36xbf16> to vector<224x36xbf16>
    %c0_2 = arith.constant 0 : index
    %c0_3 = arith.constant 0 : index
    %19 = vector.load %arg3[%c0_2, %c0_3] : memref<36x128xbf16, #tpu.memory_space<vmem>>, vector<36x128xbf16>
    %cst = arith.constant dense<0.000000e+00> : vector<224x128xf32>
    %20 = tpu.matmul %18, %19, %cst {dimension_numbers = #tpu.dot_dimension_numbers<[1], [0], [0], [1], [0, 0, 1, 1], [], []>} : vector<224x36xbf16>, vector<36x128xbf16>, vector<224x128xf32> -> vector<224x128xf32>
    %c0_4 = arith.constant 0 : index
    %c0_5 = arith.constant 0 : index
    %21 = vector.load %arg4[%c0_4, %c0_5] : memref<1x128xf32, #tpu.memory_space<vmem>>, vector<1x128xf32>
    %22 = vector.broadcast %21 : vector<1x128xf32> to vector<224x128xf32>
    %23 = arith.addf %20, %22 : vector<224x128xf32>
    %24 = arith.truncf %23 : vector<224x128xf32> to vector<224x128xbf16>
    %c0_6 = arith.constant 0 : index
    %c0_7 = arith.constant 0 : index
    %c0_8 = arith.constant 0 : index
    %c0_9 = arith.constant 0 : index
    %25 = vector.load %arg5[%c0_6, %c0_7, %c0_8, %c0_9] : memref<1x1x224x128xbf16, #tpu.memory_space<vmem>>, vector<1x1x224x128xbf16>
    %26 = vector.shape_cast %25 : vector<1x1x224x128xbf16> to vector<224x128xbf16>
    %27 = vector.shape_cast %24 : vector<224x128xbf16> to vector<1x1x224x128xbf16>
    tpu.vector_store %arg5[%c0_6, %c0_7, %c0_8, %c0_9], %27 {strides = array<i32>} : memref<1x1x224x128xbf16, #tpu.memory_space<vmem>>, vector<1x1x224x128xbf16>,
    return
  }
  func.func @transform_0(%arg0: i32, %arg1: i32) -> (i32, i32, i32, i32) {
    %c0_i32 = arith.constant 0 : i32
    %c0_i32_0 = arith.constant 0 : i32
    %c0_i32_1 = arith.constant 0 : i32
    %c0_i32_2 = arith.constant 0 : i32
    return %arg0, %c0_i32, %c0_i32_0, %c0_i32_1 : i32, i32, i32, i32
  }
  func.func @transform_1(%arg0: i32, %arg1: i32) -> (i32, i32) {
    %c0_i32 = arith.constant 0 : i32
    %c0_i32_0 = arith.constant 0 : i32
    %c0_i32_1 = arith.constant 0 : i32
    return %c0_i32, %c0_i32_0 : i32, i32
  }
  func.func @transform_2(%arg0: i32, %arg1: i32) -> (i32, i32) {
    %c0_i32 = arith.constant 0 : i32
    %c0_i32_0 = arith.constant 0 : i32
    %c0_i32_1 = arith.constant 0 : i32
    return %c0_i32, %c0_i32_0 : i32, i32
  }
  func.func @transform_3(%arg0: i32, %arg1: i32) -> (i32, i32, i32, i32) {
    %c0_i32 = arith.constant 0 : i32
    %c0_i32_0 = arith.constant 0 : i32
    %c0_i32_1 = arith.constant 0 : i32
    return %arg0, %arg1, %c0_i32, %c0_i32_0 : i32, i32, i32, i32
  }
}

</mosaic_0001>

<bundles_post_ra>
// kernel: tpu_custom_call.1
= control target key start
LH: loop header
LB: loop body
LE: loop exit
PB: predicated region body
PF: predicated region fallthrough
CT: control target
= control target key end

     0   :  { %8 = vsyncpa [#allocation3], 0  ;;  %s2772_s0 = inlined_call_operand.vmem [shape: bf16[2,18,16,4], index: 0, kind: input, shape index: {}]   ;;  %s2773_s1 = inlined_call_operand.vmem [shape: bf16[36,128], index: 1, kind: input, shape index: {}]   ;;  %s2774_s2 = inlined_call_operand.vmem [shape: f32[1,128], index: 2, kind: input, shape index: {}]   ;;  %s2775_s3 = inlined_call_operand.hbm [shape: bf16[2,1,224,128], index: 3, kind: output, shape index: {}]  }
   0x1   :  { %10 = vsyncpa [#allocation3 + $0x1], 0  ;;  %s2002_s12 = smov 0   ;;  %s2004_s13 = smov 0  }
   0x2   :  { %s2006_s14 = smov 0   ;;  %s2008_s15 = smov 0  }
   0x3   :  { %s2010_s16 = smov 0   ;;  %s2012_s17 = smov 0  }
   0x4 LB: > { %s1604_s18 = sadd.s32 4294967295, %s1971_s17   ;;  %s1605_s19 = sadd.s32 4294967294, %s1971_s17   ;;  %s1971_s17 = sphi %s2012_s17, %s16_s17   ;;  %s1967_s16 = sphi %s2010_s16, %s2782_s16   ;;  %s1963_s15 = sphi %s2008_s15, %s2781_s15   ;;  %s1959_s14 = sphi %s2006_s14, %s2780_s14   ;;  %s1955_s13 = sphi %s2004_s13, %s2779_s13   ;;  %s1951_s12 = sphi %s2002_s12, %s2778_s12  }
   0x5   : > { %s28_s20 = sadd.s32 1, %s1967_s16  ;;  %s105_s21 = sadd.s32 1, %s1959_s14 }
   0x6   : > { %p30_p0 = scmp.ge.s32.totalorder %s28_s20, 2  ;;  %p115_p1 = scmp.ne.s32.totalorder %s1959_s14, %s1955_s13 }
   0x7   : > { %p116_p2 = scmp.eq.s32.totalorder %s1604_s18, 1  ;;  %p121_p3 = scmp.ne.s32.totalorder %s1955_s13, %s1951_s12 }
   0x8   : > { %s2784_s20 = smov (%p30_p0, %s28_s20), 0  ;;  %p122_p5 = scmp.eq.s32.totalorder %s1605_s19, 1 }
   0x9   : > { %p2042_p4 = por %p116_p2, %p115_p1  ;;  %s100_s23 = ssub.s32 %s1967_s16, %s2784_s20 }
   0xa   : > { %p1608_p6 = scmp.ge.s32.totalorder %s1971_s17, 1  ;;  %p103_p7 = scmp.eq.s32.totalorder %s100_s23, 0 }
   0xb   : > { %p2049_p8 = por %p122_p5, %p121_p3  ;;  %p154_p9 = scmp.lt.s32.totalorder %s1971_s17, 3 }
   0xc   : > { %s2055_s25 = scalar_select %p103_p7, %s1959_s14, %s105_s21  }
   0xd   : > { %p155_p10 = pnand %p1608_p6, %p154_p9 }
   0xe   : > { %p178_p11 = scmp.lt.s32.totalorder (!%p155_p10), %s1963_s15, 1  ;;  %s1973_s4 = smov (!%p155_p10), 4  }
   0xf   : > { %158 = sbr.rel (%p155_p10) target bundleno = 650 (0x28a), region = 32  ;;  %s1974_s5 = smov (!%p155_p10), 8  }
  0x10   : > { %s1975_s6 = smov (!%p155_p10), 12   ;;  %s1976_s7 = smov (!%p155_p10), 16  }
  0x11   : > { %s1977_s8 = smov (!%p155_p10), 24   ;;  %s1978_s9 = smov (!%p155_p10), 20  }
  0x12   : > { %s1979_s10 = smov (!%p155_p10), 28   ;;  %s1980_s11 = smov (!%p155_p10), 32  }
  0x13   : > { %s175_s28 = sand.u32 (!%p155_p10), 1, %s1955_s13  }
  0x14   : > { %s179_s26 = scalar_select %p178_p11, %s1963_s15, 1  ;;  %vm714_vm0 = vcmask 31744   ;;  %vm747_vm1 = vcmask 64512   ;;  %vm1372_vm2 = vcmask 1041408   ;;  %vm780_vm3 = vcmask 97280  }
  0x15   : > { %vm813_vm4 = vcmask 130048   ;;  %vm846_vm5 = vcmask 162816   ;;  %vm879_vm6 = vcmask 195584   ;;  %vm912_vm7 = vcmask 228352   ;;  %s1512_s19 = scalar_lea.sflag [#allocation3], %s175_s28 }
  0x16   : > { %s1820_s27 = smul.u32 144, %s179_s26  ;;  %vm945_vm8 = vcmask 261120   ;;  %vm1343_vm9 = vcmask 293888  }
  0x18   : > { %s2062_s30 = scalar_lea.vmem %s2772_s0, %s1820_s27  ;;  %s1913_s27 = scalar_lea.hbm %s2775_s3, 224 }
  0x19   : > { %v2065_v0 = vld [vmem:[%s2062_s30 + $0x20] sm:$0xff]  ;;  %v2068_v1 = vld [vmem:[%s2062_s30 + $0x10] sm:$0xff]  ;;  %v2074_v3 = vld [vmem:[%s2062_s30 + $0x28] sm:$0xff] }
  0x1a   : > { %v2071_v2 = vld [vmem:[%s2062_s30] sm:$0xff]  ;;  %v2077_v4 = vld [vmem:[%s2062_s30 + $0x18] sm:$0xff]  ;;  %v2080_v5 = vld [vmem:[%s2062_s30 + $0x8] sm:$0xff]  ;;  %v333_v6 = vshrl.u32 %v2065_v0, 16  ;;  %v335_v7 = vshll.u32 %v2065_v0, 16  ;;  %v319_v8 = vshrl.u32 %v2068_v1, 16 }
  0x1b   : > { %v321_v9 = vshll.u32 %v2068_v1, 16  ;;  %v305_v10 = vshrl.u32 %v2071_v2, 16  ;;  %v307_v11 = vshll.u32 %v2071_v2, 16  ;;  %v342_v14 = vshll.u32 %v2074_v3, 16  ;;  %v2102_v25 = vld [vmem:[%s2062_s30 + $0x40] sm:$0xff]  ;;  %v2105_v26 = vld [vmem:[%s2062_s30 + $0x38] sm:$0xff] }
  0x1c   : > { %v337_v12 = vrot.slane %v335_v7, 1  ;;  %v328_v15 = vshll.u32 %v2077_v4, 16  ;;  %v314_v17 = vshll.u32 %v2080_v5, 16  ;;  %v340_v21 = vshrl.u32 %v2074_v3, 16  ;;  %v2110_v29 = vld [vmem:[%s2062_s30 + $0x30] sm:$0xff]  ;;  %v2128_v40 = vld [vmem:[%s2062_s30 + $0x58] sm:$0xff] }
  0x1d   : > { %v323_v13 = vrot.slane %v321_v9, 1  ;;  %v309_v16 = vrot.slane %v307_v11, 1  ;;  %v344_v22 = vrot.slane %v342_v14, 1  ;;  %v326_v23 = vshrl.u32 %v2077_v4, 16  ;;  %v2131_v41 = vld [vmem:[%s2062_s30 + $0x50] sm:$0xff]  ;;  %v2137_v44 = vld [vmem:[%s2062_s30 + $0x48] sm:$0xff] }
  0x1e   : > { %v2091_v18 = vor.u32 %v337_v12, %v333_v6  ;;  %v330_v24 = vrot.slane %v328_v15, 1  ;;  %v312_v27 = vshrl.u32 %v2080_v5, 16  ;;  %v316_v28 = vrot.slane %v314_v17, 1  ;;  %v2155_v55 = vld [vmem:[%s2062_s30 + $0x70] sm:$0xff]  ;;  %v2158_v56 = vld [vmem:[%s2062_s30 + $0x68] sm:$0xff]  ;;  %v2164_v59 = vld [vmem:[%s2062_s30 + $0x60] sm:$0xff] }
  0x1f   : > { %v2093_v19 = vor.u32 %v323_v13, %v319_v8  ;;  %v310_v20 = vor.u32 %v309_v16, %v305_v10  ;;  %v2112_v30 = vor.u32 %v344_v22, %v340_v21  ;;  %v363_v32 = vshll.u32 %v2102_v25, 16  ;;  %v2185_v14 = vld [vmem:[%s2062_s30 + $0x78] sm:$0xff] }
  0x20   : > { %424 = vrot.lane.b32.xlu2 %v2091_v18, %s1973_s4  ;;  %v2114_v31 = vor.u32 %v330_v24, %v326_v23  ;;  %v356_v33 = vshll.u32 %v2105_v26, 16  ;;  %v2118_v34 = vor.u32 %v316_v28, %v312_v27  ;;  %v349_v35 = vshll.u32 %v2110_v29, 16 }
  0x21   : > { %420 = vrot.lane.b32.xlu1 %v2093_v19, %s1973_s4  ;;  %416 = vrot.lane.b32.xlu0 %v310_v20, %s1973_s4  ;;  %v361_v36 = vshrl.u32 %v2102_v25, 16  ;;  %v365_v37 = vrot.slane %v363_v32, 1  ;;  %v354_v38 = vshrl.u32 %v2105_v26, 16  ;;  %v347_v42 = vshrl.u32 %v2110_v29, 16 }
  0x22   : > { %v358_v39 = vrot.slane %v356_v33, 1  ;;  %v351_v43 = vrot.slane %v349_v35, 1  ;;  %v384_v47 = vshll.u32 %v2128_v40, 16  ;;  %v377_v48 = vshll.u32 %v2131_v41, 16 }
  0x23   : > { %v2139_v45 = vor.u32 %v365_v37, %v361_v36  ;;  %v370_v50 = vshll.u32 %v2137_v44, 16  ;;  %v382_v51 = vshrl.u32 %v2128_v40, 16  ;;  %v375_v53 = vshrl.u32 %v2131_v41, 16 }
  0x24   : > { %v2141_v46 = vor.u32 %v358_v39, %v354_v38  ;;  %v2145_v49 = vor.u32 %v351_v43, %v347_v42  ;;  %v386_v52 = vrot.slane %v384_v47, 1  ;;  %v379_v54 = vrot.slane %v377_v48, 1 }
  0x25   : > { %v368_v57 = vshrl.u32 %v2137_v44, 16  ;;  %v372_v58 = vrot.slane %v370_v50, 1  ;;  %v405_v62 = vshll.u32 %v2155_v55, 16  ;;  %v398_v63 = vshll.u32 %v2158_v56, 16 }
  0x26   : > { %v2166_v60 = vor.u32 %v386_v52, %v382_v51  ;;  %v2168_v61 = vor.u32 %v379_v54, %v375_v53  ;;  %v391_v7 = vshll.u32 %v2164_v59, 16  ;;  %v403_v8 = vshrl.u32 %v2155_v55, 16 }
  0x27   : > { %v2172_v6 = vor.u32 %v372_v58, %v368_v57  ;;  %v407_v9 = vrot.slane %v405_v62, 1  ;;  %v396_v10 = vshrl.u32 %v2158_v56, 16  ;;  %v400_v11 = vrot.slane %v398_v63, 1 }
  0x28   : > { %426 = vrot.lane.b32.xlu2 %v2112_v30, %s1973_s4  ;;  %v389_v12 = vshrl.u32 %v2164_v59, 16  ;;  %v393_v13 = vrot.slane %v391_v7, 1  ;;  %v412_v20 = vshll.u32 %v2185_v14, 16  ;;  %v410_v21 = vshrl.u32 %v2185_v14, 16 }
  0x29   : > { %422 = vrot.lane.b32.xlu1 %v2114_v31, %s1973_s4  ;;  %418 = vrot.lane.b32.xlu0 %v2118_v34, %s1973_s4  ;;  %v2187_v15 = vor.u32 %v407_v9, %v403_v8  ;;  %v2189_v16 = vor.u32 %v400_v11, %v396_v10  ;;  %v449_v23 = vrot.slane %v2080_v5, 1  ;;  %v448_v24 = vrot.slane %v2071_v2, 1 }
  0x2a   : > { %v2191_v17 = vor.u32 %v393_v13, %v389_v12  ;;  %v414_v22 = vrot.slane %v412_v20, 1  ;;  %v452_v28 = vrot.slane %v2065_v0, 1  ;;  %v451_v32 = vrot.slane %v2077_v4, 1 }
  0x2b   : > { %v450_v33 = vrot.slane %v2068_v1, 1  ;;  %v2216_v35 = vrot.slane %v2105_v26, 1  ;;  %v454_v36 = vrot.slane %v2110_v29, 1  ;;  %v453_v37 = vrot.slane %v2074_v3, 1 }
  0x2c   : > { %v2203_v27 = vor.u32 %v414_v22, %v410_v21  ;;  %v456_v21 = vrot.slane %v2102_v25, 1 }
  0x30   : > { %432 = vrot.lane.b32.xlu2 %v2139_v45, %s1973_s4 }
  0x31   : > { %430 = vrot.lane.b32.xlu1 %v2141_v46, %s1973_s4  ;;  %428 = vrot.lane.b32.xlu0 %v2145_v49, %s1973_s4 }
  0x38   : > { %438 = vrot.lane.b32.xlu2 %v2166_v60, %s1973_s4 }
  0x39   : > { %436 = vrot.lane.b32.xlu1 %v2168_v61, %s1973_s4  ;;  %434 = vrot.lane.b32.xlu0 %v2172_v6, %s1973_s4 }
  0x40   : > { %444 = vrot.lane.b32.xlu2 %v2187_v15, %s1973_s4 }
  0x41   : > { %442 = vrot.lane.b32.xlu1 %v2189_v16, %s1973_s4  ;;  %440 = vrot.lane.b32.xlu0 %v2191_v17, %s1973_s4 }
  0x48   : > { %466 = vrot.lane.b32.xlu2 %v449_v23, %s1974_s5 }
  0x49   : > { %464 = vrot.lane.b32.xlu1 %v448_v24, %s1974_s5  ;;  %446 = vrot.lane.b32.xlu0 %v2203_v27, %s1973_s4 }
  0x50   : > { %472 = vrot.lane.b32.xlu2 %v452_v28, %s1974_s5 }
  0x51   : > { %470 = vrot.lane.b32.xlu1 %v451_v32, %s1974_s5  ;;  %468 = vrot.lane.b32.xlu0 %v450_v33, %s1974_s5 }
  0x58   : > { %478 = vrot.lane.b32.xlu2 %v2216_v35, %s1974_s5 }
  0x59   : > { %476 = vrot.lane.b32.xlu1 %v454_v36, %s1974_s5  ;;  %474 = vrot.lane.b32.xlu0 %v453_v37, %s1974_s5 }
  0x60   : > { %503 = vrot.lane.b32.xlu2 %v2068_v1, %s1975_s6 }
  0x61   : > { %540 = vrot.lane.b32.xlu1 %v2118_v34, %s1976_s7  ;;  %501 = vrot.lane.b32.xlu0 %v2080_v5, %s1975_s6 }
  0x68   : > { %610 = vrot.lane.b32.xlu2 %v2068_v1, %s1977_s8 }
  0x69   : > { %542 = vrot.lane.b32.xlu1 %v2093_v19, %s1976_s7  ;;  %573 = vrot.lane.b32.xlu0 %v449_v23, %s1978_s9 }
  0x70   : > { %612 = vrot.lane.b32.xlu2 %v2077_v4, %s1977_s8 }
  0x71   : > { %649 = vrot.lane.b32.xlu1 %v2093_v19, %s1979_s10  ;;  %575 = vrot.lane.b32.xlu0 %v450_v33, %s1978_s9 }
  0x78   : > { %684 = vrot.lane.b32.xlu2 %v451_v32, %s1980_s11 }
  0x79   : > { %651 = vrot.lane.b32.xlu1 %v2114_v31, %s1979_s10  ;;  %682 = vrot.lane.b32.xlu0 %v450_v33, %s1980_s11 }
  0x7a   : > { %v425_v34 = vpop.permute.xlu2 %424 }
  0x7b   : > { %v724_v52 = vsel %vm714_vm0, %v2065_v0, %v425_v34 }
  0x80   : > { %577 = vrot.lane.b32.xlu2 %v451_v32, %s1978_s9 }
  0x81   : > { %544 = vrot.lane.b32.xlu1 %v2114_v31, %s1976_s7  ;;  %505 = vrot.lane.b32.xlu0 %v2077_v4, %s1975_s6 }
  0x82   : > { %v2249_v19 = vpop.permute.xlu2 %426 }
  0x83   : > { %v726_v22 = vsel %vm714_vm0, %v2074_v3, %v2249_v19 }
  0x88   : > { %686 = vrot.lane.b32.xlu2 %v452_v28, %s1980_s11 }
  0x89   : > { %653 = vrot.lane.b32.xlu1 %v2091_v18, %s1979_s10  ;;  %614 = vrot.lane.b32.xlu0 %v2065_v0, %s1977_s8 }
  0x8a   : > { %v2256_v38 = vpop.permute.xlu2 %432 }
  0x90   : > { %579 = vrot.lane.b32.xlu2 %v452_v28, %s1978_s9 }
  0x91   : > { %546 = vrot.lane.b32.xlu1 %v2091_v18, %s1976_s7  ;;  %507 = vrot.lane.b32.xlu0 %v2065_v0, %s1975_s6 }
  0x92   : > { %v2263_v31 = vpop.permute.xlu2 %438 }
  0x93   : > { %v2265_v39 = vpop.permute.xlu1 %420  ;;  %v2267_v42 = vpop.permute.xlu0 %416 }
  0x98   : > { %688 = vrot.lane.b32.xlu2 %v453_v37, %s1980_s11 }
  0x99   : > { %655 = vrot.lane.b32.xlu1 %v2112_v30, %s1979_s10  ;;  %616 = vrot.lane.b32.xlu0 %v2074_v3, %s1977_s8 }
  0x9a   : > { %v2274_v43 = vpop.permute.xlu2 %444 }
  0x9b   : > { %v423_v18 = vpop.permute.xlu1 %422  ;;  %v2276_v47 = vpop.permute.xlu0 %418 }
  0x9c   : > { %v722_v10 = vsel %vm714_vm0, %v2077_v4, %v423_v18 }
  0xa0   : > { %581 = vrot.lane.b32.xlu2 %v453_v37, %s1978_s9 }
  0xa1   : > { %548 = vrot.lane.b32.xlu1 %v2112_v30, %s1976_s7  ;;  %509 = vrot.lane.b32.xlu0 %v2074_v3, %s1975_s6 }
  0xa2   : > { %v2283_v50 = vpop.permute.xlu2 %466 }
  0xa3   : > { %v431_v48 = vpop.permute.xlu1 %430  ;;  %v429_v51 = vpop.permute.xlu0 %428 }
  0xa4   : > { %v730_v0 = vsel %vm714_vm0, %v2105_v26, %v431_v48  ;;  %v728_v4 = vsel %vm714_vm0, %v2110_v29, %v429_v51  ;;  %v1725_v51 = vld [vmem:[%s2773_s1] sm:$0xff] }
  0xa8   : > { %690 = vrot.lane.b32.xlu2 %v454_v36, %s1980_s11 }
  0xa9   : > { %657 = vrot.lane.b32.xlu1 %v2145_v49, %s1979_s10  ;;  %618 = vrot.lane.b32.xlu0 %v2110_v29, %s1977_s8 }
  0xaa   : > { %v473_v53 = vpop.permute.xlu2 %472 }
  0xab   : > { %v2292_v30 = vpop.permute.xlu1 %436  ;;  %v2295_v54 = vsel %vm747_vm1, %v724_v52, %v473_v53  ;;  %v2297_v57 = vpop.permute.xlu0 %434  ;;  %v716_v52 = vsel %vm714_vm0, %v2071_v2, %v2267_v42 }
  0xb0   : > { %583 = vrot.lane.b32.xlu2 %v454_v36, %s1978_s9  ;;  %v457_v36 = vrot.slane %v2137_v44, 1 }
  0xb1   : > { %550 = vrot.lane.b32.xlu1 %v2145_v49, %s1976_s7  ;;  %511 = vrot.lane.b32.xlu0 %v2110_v29, %s1975_s6  ;;  %v1094_v29 = vld [vmem:[%s2773_s1 + $0x10] sm:$0x3] }
  0xb2   : > { %v479_v62 = vpop.permute.xlu2 %478  ;;  %v1337_v33 = vunpack.c.l.b16 %v1094_v29 }
  0xb3   : > { %v2306_v58 = vpop.permute.xlu1 %442  ;;  %v2309_v63 = vsel %vm747_vm1, %v730_v0, %v479_v62  ;;  %v2311_v7 = vpop.permute.xlu0 %440 }
  0xb4   : > { %v1340_v37 = vpack.c.b16 %v1337_v33, %v1337_v33 }
  0xb6   : > { %v1374_v34 = vsel %vm1372_vm2, %v1340_v37, 0 }
  0xb7   : > { %1381 = vmatpush.bf16.msra.mxu0 %v1374_v34  ;;  %1810 = vmatpush.bf16.msra.mxu1 %v1374_v34 }
  0xb8   : > { %692 = vrot.lane.b32.xlu2 %v2216_v35, %s1980_s11  ;;  %1811 = vmatpush.bf16.msra.mxu2 %v1374_v34 }
  0xb9   : > { %659 = vrot.lane.b32.xlu1 %v2141_v46, %s1979_s10  ;;  %620 = vrot.lane.b32.xlu0 %v2105_v26, %s1977_s8 }
  0xba   : > { %v2319_v49 = vpop.permute.xlu2 %503  ;;  %1812 = vmatpush.bf16.msra.mxu3 %v1374_v34 }
  0xbb   : > { %v465_v8 = vpop.permute.xlu1 %464  ;;  %v2321_v9 = vpop.permute.xlu0 %446 }
  0xbc   : > { %v749_v53 = vsel %vm747_vm1, %v716_v52, %v465_v8 }
  0xc0   : > { %585 = vrot.lane.b32.xlu2 %v2216_v35, %s1978_s9 }
  0xc1   : > { %552 = vrot.lane.b32.xlu1 %v2141_v46, %s1976_s7  ;;  %513 = vrot.lane.b32.xlu0 %v2105_v26, %s1975_s6 }
  0xc2   : > { %v2331_v11 = vpop.permute.xlu2 %610 }
  0xc3   : > { %v471_v12 = vpop.permute.xlu1 %470  ;;  %v2336_v20 = vpop.permute.xlu0 %468 }
  0xc4   : > { %v2334_v13 = vsel %vm747_vm1, %v722_v10, %v471_v12  ;;  %v718_v10 = vsel %vm714_vm0, %v2080_v5, %v2276_v47 }
  0xc5   : > { %v751_v2 = vsel %vm747_vm1, %v718_v10, %v2283_v50 }
  0xc6   : > { %v784_v42 = vsel %vm780_vm3, %v751_v2, %v2319_v49 }
  0xc8   : > { %694 = vrot.lane.b32.xlu2 %v456_v21, %s1980_s11 }
  0xc9   : > { %661 = vrot.lane.b32.xlu1 %v2139_v45, %s1979_s10  ;;  %622 = vrot.lane.b32.xlu0 %v2102_v25, %s1977_s8 }
  0xca   : > { %v2346_v26 = vpop.permute.xlu2 %612 }
  0xcb   : > { %v477_v46 = vpop.permute.xlu1 %476  ;;  %v475_v24 = vpop.permute.xlu0 %474 }
  0xcc   : > { %v2352_v23 = vsel %vm747_vm1, %v728_v4, %v477_v46  ;;  %v2355_v28 = vsel %vm747_vm1, %v726_v22, %v475_v24 }
  0xd0   : > { %587 = vrot.lane.b32.xlu2 %v456_v21, %s1978_s9 }
  0xd1   : > { %554 = vrot.lane.b32.xlu1 %v2139_v45, %s1976_s7  ;;  %515 = vrot.lane.b32.xlu0 %v2102_v25, %s1975_s6  ;;  %v1726_v45 = vld [vmem:[%s2773_s1 + $0x8] sm:$0xff] }
  0xd2   : > { %v685_v3 = vpop.permute.xlu2 %684  ;;  %1382 = vmatpush.bf16.msra.mxu0 %v1726_v45  ;;  %1813 = vmatpush.bf16.msra.mxu1 %v1726_v45 }
  0xd3   : > { %v541_v32 = vpop.permute.xlu1 %540  ;;  %v502_v35 = vpop.permute.xlu0 %501  ;;  %1814 = vmatpush.bf16.msra.mxu2 %v1726_v45  ;;  %1815 = vmatpush.bf16.msra.mxu3 %v1726_v45 }
  0xd4   : > { %v782_v12 = vsel %vm780_vm3, %v749_v53, %v502_v35 }
  0xd6   : > { %1383 = vmatpush.bf16.msra.mxu0 %v1725_v51  ;;  %1816 = vmatpush.bf16.msra.mxu1 %v1725_v51 }
  0xd7   : > { %1817 = vmatpush.bf16.msra.mxu2 %v1725_v51  ;;  %1818 = vmatpush.bf16.msra.mxu3 %v1725_v51 }
  0xd8   : > { %696 = vrot.lane.b32.xlu2 %v457_v36, %s1980_s11 }
  0xd9   : > { %663 = vrot.lane.b32.xlu1 %v2172_v6, %s1979_s10  ;;  %624 = vrot.lane.b32.xlu0 %v2137_v44, %s1977_s8 }
  0xda   : > { %v2374_v19 = vpop.permute.xlu2 %577 }
  0xdb   : > { %v543_v18 = vpop.permute.xlu1 %542  ;;  %v574_v48 = vpop.permute.xlu0 %573 }
  0xdc   : > { %v817_v8 = vsel %vm813_vm4, %v784_v42, %v543_v18  ;;  %v2442_v42 = vrot.slane %v2128_v40, 1 }
  0xe0   : > { %482 = vrot.lane.b32.xlu2 %v457_v36, %s1974_s5 }
  0xe1   : > { %517 = vrot.lane.b32.xlu1 %v2137_v44, %s1975_s6  ;;  %480 = vrot.lane.b32.xlu0 %v456_v21, %s1974_s5  ;;  %v815_v21 = vsel %vm813_vm4, %v782_v12, %v541_v32 }
  0xe2   : > { %v2387_v0 = vpop.permute.xlu2 %686  ;;  %v848_v46 = vsel %vm846_vm5, %v815_v21, %v574_v48  ;;  %v720_v48 = vsel %vm714_vm0, %v2068_v1, %v2265_v39 }
  0xe3   : > { %v650_v62 = vpop.permute.xlu1 %649  ;;  %v576_v4 = vpop.permute.xlu0 %575  ;;  %v881_v47 = vsel %vm879_vm6, %v848_v46, %v2331_v11  ;;  %v753_v52 = vsel %vm747_vm1, %v720_v48, %v2336_v20 }
  0xe4   : > { %v850_v5 = vsel %vm846_vm5, %v817_v8, %v576_v4  ;;  %v914_v24 = vsel %vm912_vm7, %v881_v47, %v650_v62 }
  0xe5   : > { %v883_v22 = vsel %vm879_vm6, %v850_v5, %v2346_v26 }
  0xe8   : > { %589 = vrot.lane.b32.xlu2 %v457_v36, %s1978_s9 }
  0xe9   : > { %519 = vrot.lane.b32.xlu1 %v2131_v41, %s1975_s6  ;;  %556 = vrot.lane.b32.xlu0 %v2172_v6, %s1976_s7  ;;  %v458_v6 = vrot.slane %v2131_v41, 1 }
  0xea   : > { %v2408_v50 = vpop.permute.xlu2 %579 }
  0xeb   : > { %v652_v49 = vpop.permute.xlu1 %651  ;;  %v683_v32 = vpop.permute.xlu0 %682 }
  0xec   : > { %v916_v29 = vsel %vm912_vm7, %v883_v22, %v652_v49  ;;  %v947_v35 = vsel %vm945_vm8, %v914_v24, %v683_v32 }
  0xed   : > { %v949_v33 = vsel %vm945_vm8, %v916_v29, %v685_v3  ;;  %v994_v36 = vrot.slane %v947_v35, 1  ;;  %v995_v11 = vrot.slane %v947_v35, 2  ;;  %1099 = vst [vmem:[#allocation1] ss:$9 sm:$0xff] %v947_v35  ;;  %v996_v37 = vrot.slane %v947_v35, 3 }
  0xee   : > { %1119 = vst [vmem:[#allocation1 + $0x7] ss:$9 sm:$0xff] %v949_v33  ;;  %v997_v34 = vrot.slane %v947_v35, 4  ;;  %v998_v45 = vrot.slane %v947_v35, 5  ;;  %v999_v26 = vrot.slane %v947_v35, 6  ;;  %v1000_v62 = vrot.slane %v949_v33, 1 }
  0xef   : > { %1102 = vst [vmem:[#allocation1 + $0x1] ss:$9 sm:$0xff] %v994_v36  ;;  %v1001_v12 = vrot.slane %v949_v33, 2  ;;  %v1002_v8 = vrot.slane %v949_v33, 3  ;;  %v1003_v21 = vrot.slane %v949_v33, 4  ;;  %v1005_v5 = vrot.slane %v949_v33, 6 }
  0xf0   : > { %591 = vrot.lane.b32.xlu2 %v458_v6, %s1978_s9  ;;  %1105 = vst [vmem:[#allocation1 + $0x2] ss:$9 sm:$0xff] %v995_v11 }
  0xf1   : > { %626 = vrot.lane.b32.xlu1 %v2131_v41, %s1977_s8  ;;  %558 = vrot.lane.b32.xlu0 %v2168_v61, %s1976_s7  ;;  %1108 = vst [vmem:[#allocation1 + $0x3] ss:$9 sm:$0xff] %v996_v37 }
  0xf2   : > { %v2422_v3 = vpop.permute.xlu2 %688  ;;  %1111 = vst [vmem:[#allocation1 + $0x4] ss:$9 sm:$0xff] %v997_v34 }
  0xf3   : > { %v545_v18 = vpop.permute.xlu1 %544  ;;  %v506_v51 = vpop.permute.xlu0 %505  ;;  %1114 = vst [vmem:[#allocation1 + $0x5] ss:$9 sm:$0xff] %v998_v45  ;;  %v460_v45 = vrot.slane %v2164_v59, 1 }
  0xf4   : > { %1117 = vst [vmem:[#allocation1 + $0x6] ss:$9 sm:$0xff] %v999_v26  ;;  %v786_v41 = vsel %vm780_vm3, %v753_v52, %v506_v51 }
  0xf5   : > { %v819_v53 = vsel %vm813_vm4, %v786_v41, %v545_v18 }
  0xf6   : > { %v852_v20 = vsel %vm846_vm5, %v819_v53, %v2374_v19  ;;  %v1004_v19 = vrot.slane %v949_v33, 5 }
  0xf8   : > { %698 = vrot.lane.b32.xlu2 %v458_v6, %s1980_s11 }
  0xf9   : > { %628 = vrot.lane.b32.xlu1 %v2128_v40, %s1977_s8  ;;  %665 = vrot.lane.b32.xlu0 %v2168_v61, %s1979_s10 }
  0xfa   : > { %v2436_v1 = vpop.permute.xlu2 %581 }
  0xfb   : > { %v654_v39 = vpop.permute.xlu1 %653  ;;  %v615_v10 = vpop.permute.xlu0 %614  ;;  %v1120_v4 = vld [vmem:[#allocation1] sm:$0xff] }
  0xfc   : > { %v885_v2 = vsel %vm879_vm6, %v852_v20, %v615_v10  ;;  %1122 = vst [vmem:[#allocation1] ss:$9 sm:$0xff] %v1000_v62  ;;  %1690 = vmatmul.msk.bf16.vlgmr.msra.gmra.mxu0 %vm1343_vm9, %v1120_v4 }
  0xfd   : > { %v918_v61 = vsel %vm912_vm7, %v885_v2, %v654_v39  ;;  %1124 = vst [vmem:[#allocation1 + $0x1] ss:$9 sm:$0xff] %v1001_v12 }
  0xfe   : > { %v951_v46 = vsel %vm945_vm8, %v918_v61, %v2387_v0  ;;  %1126 = vst [vmem:[#allocation1 + $0x2] ss:$9 sm:$0xff] %v1002_v8 }
  0xff   : > { %1128 = vst [vmem:[#allocation1 + $0x3] ss:$9 sm:$0xff] %v1003_v21  ;;  %v1006_v47 = vrot.slane %v951_v46, 1  ;;  %v1007_v32 = vrot.slane %v951_v46, 2  ;;  %v1009_v37 = vrot.slane %v951_v46, 4  ;;  %v1011_v26 = vrot.slane %v951_v46, 6 }
 0x100   : > { %700 = vrot.lane.b32.xlu2 %v2442_v42, %s1980_s11  ;;  %1130 = vst [vmem:[#allocation1 + $0x4] ss:$9 sm:$0xff] %v1004_v19 }
 0x101   : > { %484 = vrot.lane.b32.xlu1 %v458_v6, %s1974_s5  ;;  %667 = vrot.lane.b32.xlu0 %v2166_v60, %s1979_s10  ;;  %1132 = vst [vmem:[#allocation1 + $0x5] ss:$9 sm:$0xff] %v1005_v5  ;;  %v1008_v6 = vrot.slane %v951_v46, 3 }
 0x102   : > { %v2453_v49 = vpop.permute.xlu2 %690  ;;  %1133 = vst [vmem:[#allocation1 + $0x6] ss:$9 sm:$0xff] %v951_v46 }
 0x103   : > { %v547_v22 = vpop.permute.xlu1 %546  ;;  %v508_v0 = vpop.permute.xlu0 %507  ;;  %1135 = vst [vmem:[#allocation1 + $0x7] ss:$9 sm:$0xff] %v1006_v47 }
 0x104   : > { %v788_v24 = vsel %vm780_vm3, %v2334_v13, %v508_v0 }
 0x105   : > { %v821_v29 = vsel %vm813_vm4, %v788_v24, %v547_v22 }
 0x106   : > { %v854_v13 = vsel %vm846_vm5, %v821_v29, %v2408_v50 }
 0x108   : > { %593 = vrot.lane.b32.xlu2 %v2442_v42, %s1978_s9 }
 0x109   : > { %560 = vrot.lane.b32.xlu1 %v2166_v60, %s1976_s7  ;;  %521 = vrot.lane.b32.xlu0 %v2128_v40, %s1975_s6  ;;  %v1010_v60 = vrot.slane %v951_v46, 5 }
 0x10a   : > { %v2464_v33 = vpop.permute.xlu2 %583  ;;  %v1136_v36 = vld [vmem:[#allocation1] sm:$0xff] }
 0x10b   : > { %v656_v35 = vpop.permute.xlu1 %655  ;;  %v617_v11 = vpop.permute.xlu0 %616  ;;  %1138 = vst [vmem:[#allocation1] ss:$9 sm:$0xff] %v1007_v32 }
 0x10c   : > { %v887_v34 = vsel %vm879_vm6, %v854_v13, %v617_v11  ;;  %1140 = vst [vmem:[#allocation1 + $0x1] ss:$9 sm:$0xff] %v1008_v6  ;;  %1691 = vmatmul.msk.bf16.gmra.mxu0 %vm1343_vm9, %v1136_v36 }
 0x10d   : > { %v920_v40 = vsel %vm912_vm7, %v887_v34, %v656_v35  ;;  %1142 = vst [vmem:[#allocation1 + $0x2] ss:$9 sm:$0xff] %v1009_v37 }
 0x10e   : > { %v953_v18 = vsel %vm945_vm8, %v920_v40, %v2422_v3  ;;  %1144 = vst [vmem:[#allocation1 + $0x3] ss:$9 sm:$0xff] %v1010_v60 }
 0x10f   : > { %v1012_v50 = vrot.slane %v953_v18, 1  ;;  %v1013_v48 = vrot.slane %v953_v18, 2  ;;  %1146 = vst [vmem:[#allocation1 + $0x4] ss:$9 sm:$0xff] %v1011_v26  ;;  %v1014_v39 = vrot.slane %v953_v18, 3  ;;  %v1015_v62 = vrot.slane %v953_v18, 4 }
 0x110   : > { %702 = vrot.lane.b32.xlu2 %v460_v45, %s1980_s11  ;;  %1147 = vst [vmem:[#allocation1 + $0x5] ss:$9 sm:$0xff] %v953_v18  ;;  %v1016_v4 = vrot.slane %v953_v18, 5  ;;  %v1017_v8 = vrot.slane %v953_v18, 6  ;;  %v2524_v18 = vrot.slane %v2155_v55, 1 }
 0x111   : > { %669 = vrot.lane.b32.xlu1 %v2191_v17, %s1979_s10  ;;  %630 = vrot.lane.b32.xlu0 %v2164_v59, %s1977_s8  ;;  %1149 = vst [vmem:[#allocation1 + $0x6] ss:$9 sm:$0xff] %v1012_v50 }
 0x112   : > { %v693_v51 = vpop.permute.xlu2 %692  ;;  %1151 = vst [vmem:[#allocation1 + $0x7] ss:$9 sm:$0xff] %v1013_v48 }
 0x113   : > { %v549_v52 = vpop.permute.xlu1 %548  ;;  %v510_v41 = vpop.permute.xlu0 %509 }
 0x114   : > { %v790_v3 = vsel %vm780_vm3, %v2295_v54, %v510_v41 }
 0x115   : > { %v823_v53 = vsel %vm813_vm4, %v790_v3, %v549_v52 }
 0x116   : > { %v856_v54 = vsel %vm846_vm5, %v823_v53, %v2436_v1 }
 0x118   : > { %562 = vrot.lane.b32.xlu2 %v2191_v17, %s1976_s7 }
 0x119   : > { %523 = vrot.lane.b32.xlu1 %v2164_v59, %s1975_s6  ;;  %486 = vrot.lane.b32.xlu0 %v2442_v42, %s1974_s5  ;;  %v1152_v20 = vld [vmem:[#allocation1] sm:$0xff] }
 0x11a   : > { %v2488_v10 = vpop.permute.xlu2 %585  ;;  %1154 = vst [vmem:[#allocation1] ss:$9 sm:$0xff] %v1014_v39 }
 0x11b   : > { %v658_v12 = vpop.permute.xlu1 %657  ;;  %v619_v2 = vpop.permute.xlu0 %618  ;;  %1156 = vst [vmem:[#allocation1 + $0x1] ss:$9 sm:$0xff] %v1015_v62 }
 0x11c   : > { %v889_v17 = vsel %vm879_vm6, %v856_v54, %v619_v2  ;;  %1158 = vst [vmem:[#allocation1 + $0x2] ss:$9 sm:$0xff] %v1016_v4  ;;  %1692 = vmatmul.msk.bf16.gmra.mxu0 %vm1343_vm9, %v1152_v20 }
 0x11d   : > { %v922_v59 = vsel %vm912_vm7, %v889_v17, %v658_v12  ;;  %1160 = vst [vmem:[#allocation1 + $0x3] ss:$9 sm:$0xff] %v1017_v8 }
 0x11e   : > { %v955_v42 = vsel %vm945_vm8, %v922_v59, %v2453_v49  ;;  %v461_v49 = vrot.slane %v2158_v56, 1 }
 0x11f   : > { %v1018_v61 = vrot.slane %v955_v42, 1  ;;  %v1019_v21 = vrot.slane %v955_v42, 2  ;;  %v1020_v46 = vrot.slane %v955_v42, 3  ;;  %1161 = vst [vmem:[#allocation1 + $0x4] ss:$9 sm:$0xff] %v955_v42  ;;  %v1021_v0 = vrot.slane %v955_v42, 4 }
 0x120   : > { %671 = vrot.lane.b32.xlu2 %v2189_v16, %s1979_s10  ;;  %v1022_v24 = vrot.slane %v955_v42, 5  ;;  %v1023_v6 = vrot.slane %v955_v42, 6  ;;  %v463_v42 = vrot.slane %v2185_v14, 1 }
 0x121   : > { %632 = vrot.lane.b32.xlu1 %v2158_v56, %s1977_s8  ;;  %1163 = vst [vmem:[#allocation1 + $0x5] ss:$9 sm:$0xff] %v1018_v61  ;;  %595 = vrot.lane.b32.xlu0 %v460_v45, %s1978_s9 }
 0x122   : > { %1165 = vst [vmem:[#allocation1 + $0x6] ss:$9 sm:$0xff] %v1019_v21  ;;  %v695_v1 = vpop.permute.xlu2 %694 }
 0x123   : > { %v551_v19 = vpop.permute.xlu1 %550  ;;  %1167 = vst [vmem:[#allocation1 + $0x7] ss:$9 sm:$0xff] %v1020_v46  ;;  %v512_v5 = vpop.permute.xlu0 %511 }
 0x124   : > { %v792_v47 = vsel %vm780_vm3, %v2355_v28, %v512_v5 }
 0x125   : > { %v825_v22 = vsel %vm813_vm4, %v792_v47, %v551_v19  ;;  %v1723_v47 = vld [vmem:[%s2062_s30 + $0x80] sm:$0xff] }
 0x126   : > { %v858_v28 = vsel %vm846_vm5, %v825_v22, %v2464_v33 }
 0x128   : > { %525 = vrot.lane.b32.xlu2 %v2158_v56, %s1975_s6 }
 0x129   : > { %488 = vrot.lane.b32.xlu1 %v460_v45, %s1974_s5  ;;  %704 = vrot.lane.b32.xlu0 %v461_v49, %s1980_s11 }
 0x12a   : > { %v1168_v29 = vld [vmem:[#allocation1] sm:$0xff]  ;;  %v2510_v32 = vpop.permute.xlu2 %587 }
 0x12b   : > { %v660_v35 = vpop.permute.xlu1 %659  ;;  %1170 = vst [vmem:[#allocation1] ss:$9 sm:$0xff] %v1021_v0  ;;  %v621_v36 = vpop.permute.xlu0 %620  ;;  %v536_v0 = vshll.u32 %v1723_v47, 16 }
 0x12c   : > { %1172 = vst [vmem:[#allocation1 + $0x1] ss:$9 sm:$0xff] %v1022_v24  ;;  %v891_v13 = vsel %vm879_vm6, %v858_v28, %v621_v36  ;;  %1693 = vmatmul.msk.bf16.gmra.mxu0 %vm1343_vm9, %v1168_v29 }
 0x12d   : > { %1174 = vst [vmem:[#allocation1 + $0x2] ss:$9 sm:$0xff] %v1023_v6  ;;  %v924_v56 = vsel %vm912_vm7, %v891_v13, %v660_v35  ;;  %v534_v13 = vshrl.u32 %v1723_v47, 16 }
 0x12e   : > { %v957_v11 = vsel %vm945_vm8, %v924_v56, %v693_v51  ;;  %v538_v56 = vrot.slane %v536_v0, 1 }
 0x12f   : > { %v1024_v37 = vrot.slane %v957_v11, 1  ;;  %v1025_v34 = vrot.slane %v957_v11, 2  ;;  %v1026_v45 = vrot.slane %v957_v11, 3  ;;  %1175 = vst [vmem:[#allocation1 + $0x3] ss:$9 sm:$0xff] %v957_v11  ;;  %v1027_v60 = vrot.slane %v957_v11, 4 }
 0x130   : > { %634 = vrot.lane.b32.xlu2 %v2155_v55, %s1977_s8  ;;  %v1029_v41 = vrot.slane %v957_v11, 6 }
 0x131   : > { %597 = vrot.lane.b32.xlu1 %v461_v49, %s1978_s9  ;;  %1177 = vst [vmem:[#allocation1 + $0x4] ss:$9 sm:$0xff] %v1024_v37  ;;  %564 = vrot.lane.b32.xlu0 %v2189_v16, %s1976_s7  ;;  %v1028_v16 = vrot.slane %v957_v11, 5  ;;  %v539_v37 = vor.u32 %v538_v56, %v534_v13 }
 0x132   : > { %1179 = vst [vmem:[#allocation1 + $0x5] ss:$9 sm:$0xff] %v1025_v34  ;;  %v697_v33 = vpop.permute.xlu2 %696 }
 0x133   : > { %v553_v40 = vpop.permute.xlu1 %552  ;;  %1181 = vst [vmem:[#allocation1 + $0x6] ss:$9 sm:$0xff] %v1026_v45  ;;  %v514_v26 = vpop.permute.xlu0 %513 }
 0x134   : > { %1183 = vst [vmem:[#allocation1 + $0x7] ss:$9 sm:$0xff] %v1027_v60  ;;  %v794_v50 = vsel %vm780_vm3, %v2352_v23, %v514_v26  ;;  %v572_v60 = vrot.slane %v1723_v47, 1  ;;  %v732_v26 = vsel %vm714_vm0, %v2102_v25, %v2256_v38 }
 0x135   : > { %v827_v48 = vsel %vm813_vm4, %v794_v50, %v553_v40  ;;  %v1724_v40 = vld [vmem:[%s2062_s30 + $0x88] sm:$0xff] }
 0x136   : > { %v860_v53 = vsel %vm846_vm5, %v827_v48, %v2488_v10 }
 0x138   : > { %490 = vrot.lane.b32.xlu2 %v461_v49, %s1974_s5 }
 0x139   : > { %706 = vrot.lane.b32.xlu1 %v2524_v18, %s1980_s11  ;;  %673 = vrot.lane.b32.xlu0 %v2187_v15, %s1979_s10 }
 0x13a   : > { %v2534_v51 = vpop.permute.xlu2 %482 }
 0x13b   : > { %v662_v52 = vpop.permute.xlu1 %661  ;;  %v1184_v3 = vld [vmem:[#allocation1] sm:$0xff]  ;;  %v623_v23 = vpop.permute.xlu0 %622 }
 0x13c   : > { %1186 = vst [vmem:[#allocation1] ss:$9 sm:$0xff] %v1028_v16  ;;  %1694 = vmatmul.msk.bf16.vlgmr.msra.gmra.mxu1 %vm1343_vm9, %v1184_v3  ;;  %v893_v39 = vsel %vm879_vm6, %v860_v53, %v623_v23  ;;  %v645_v16 = vshll.u32 %v1724_v40, 16  ;;  %v643_v3 = vshrl.u32 %v1724_v40, 16 }
 0x13d   : > { %1188 = vst [vmem:[#allocation1 + $0x1] ss:$9 sm:$0xff] %v1029_v41  ;;  %v926_v62 = vsel %vm912_vm7, %v893_v39, %v662_v52 }
 0x13e   : > { %v959_v20 = vsel %vm945_vm8, %v926_v62, %v695_v1  ;;  %v647_v53 = vrot.slane %v645_v16, 1 }
 0x13f   : > { %v1030_v12 = vrot.slane %v959_v20, 1  ;;  %v1031_v4 = vrot.slane %v959_v20, 2  ;;  %v1032_v54 = vrot.slane %v959_v20, 3  ;;  %1189 = vst [vmem:[#allocation1 + $0x2] ss:$9 sm:$0xff] %v959_v20  ;;  %v1033_v2 = vrot.slane %v959_v20, 4 }
 0x140   : > { %599 = vrot.lane.b32.xlu2 %v2524_v18, %s1978_s9  ;;  %v1034_v10 = vrot.slane %v959_v20, 5  ;;  %v1035_v21 = vrot.slane %v959_v20, 6  ;;  %v734_v20 = vsel %vm714_vm0, %v2137_v44, %v2297_v57 }
 0x141   : > { %566 = vrot.lane.b32.xlu1 %v2187_v15, %s1976_s7  ;;  %1191 = vst [vmem:[#allocation1 + $0x3] ss:$9 sm:$0xff] %v1030_v12  ;;  %527 = vrot.lane.b32.xlu0 %v2155_v55, %s1975_s6 }
 0x142   : > { %1193 = vst [vmem:[#allocation1 + $0x4] ss:$9 sm:$0xff] %v1031_v4  ;;  %v2548_v8 = vpop.permute.xlu2 %589  ;;  %v681_v4 = vrot.slane %v1724_v40, 1 }
 0x143   : > { %v555_v17 = vpop.permute.xlu1 %554  ;;  %1195 = vst [vmem:[#allocation1 + $0x5] ss:$9 sm:$0xff] %v1032_v54  ;;  %v516_v59 = vpop.permute.xlu0 %515  ;;  %v767_v54 = vsel %vm747_vm1, %v734_v20, %v2534_v51 }
 0x144   : > { %1197 = vst [vmem:[#allocation1 + $0x6] ss:$9 sm:$0xff] %v1033_v2  ;;  %v796_v15 = vsel %vm780_vm3, %v2309_v63, %v516_v59 }
 0x145   : > { %1199 = vst [vmem:[#allocation1 + $0x7] ss:$9 sm:$0xff] %v1034_v10  ;;  %v829_v61 = vsel %vm813_vm4, %v796_v15, %v555_v17  ;;  %v648_v10 = vor.u32 %v647_v53, %v643_v3  ;;  %v1888_v53 = vld [vmem:[%s2062_s30 + $0x58] sm:$0xff] }
 0x146   : > { %v862_v46 = vsel %vm846_vm5, %v829_v61, %v2510_v32 }
 0x148   : > { %708 = vrot.lane.b32.xlu2 %v463_v42, %s1980_s11 }
 0x149   : > { %675 = vrot.lane.b32.xlu1 %v2203_v27, %s1979_s10  ;;  %636 = vrot.lane.b32.xlu0 %v2185_v14, %s1977_s8 }
 0x14a   : > { %v2561_v63 = vpop.permute.xlu2 %591 }
 0x14b   : > { %v664_v55 = vpop.permute.xlu1 %663  ;;  %v625_v1 = vpop.permute.xlu0 %624 }
 0x14c   : > { %v1200_v19 = vld [vmem:[#allocation1] sm:$0xff]  ;;  %v895_v5 = vsel %vm879_vm6, %v862_v46, %v625_v1 }
 0x14d   : > { %1202 = vst [vmem:[#allocation1] ss:$9 sm:$0xff] %v1035_v21  ;;  %1695 = vmatmul.msk.bf16.gmra.mxu1 %vm1343_vm9, %v1200_v19  ;;  %v928_v49 = vsel %vm912_vm7, %v895_v5, %v664_v55 }
 0x14e   : > { %v961_v22 = vsel %vm945_vm8, %v928_v49, %v697_v33  ;;  %v1887_v49 = vld [vmem:[%s2062_s30 + $0x50] sm:$0xff] }
 0x14f   : > { %v1036_v24 = vrot.slane %v961_v22, 1  ;;  %v1037_v29 = vrot.slane %v961_v22, 2  ;;  %v1038_v35 = vrot.slane %v961_v22, 3  ;;  %1203 = vst [vmem:[#allocation1 + $0x1] ss:$9 sm:$0xff] %v961_v22  ;;  %v1039_v32 = vrot.slane %v961_v22, 4 }
 0x150   : > { %568 = vrot.lane.b32.xlu2 %v2203_v27, %s1976_s7  ;;  %v1040_v6 = vrot.slane %v961_v22, 5  ;;  %v1041_v28 = vrot.slane %v961_v22, 6 }
 0x151   : > { %529 = vrot.lane.b32.xlu1 %v2185_v14, %s1975_s6  ;;  %1205 = vst [vmem:[#allocation1 + $0x2] ss:$9 sm:$0xff] %v1036_v24  ;;  %492 = vrot.lane.b32.xlu0 %v2524_v18, %s1974_s5 }
 0x152   : > { %1207 = vst [vmem:[#allocation1 + $0x3] ss:$9 sm:$0xff] %v1037_v29  ;;  %v699_v14 = vpop.permute.xlu2 %698 }
 0x153   : > { %v518_v36 = vpop.permute.xlu1 %517  ;;  %1209 = vst [vmem:[#allocation1 + $0x4] ss:$9 sm:$0xff] %v1038_v35  ;;  %v481_v11 = vpop.permute.xlu0 %480 }
 0x154   : > { %1211 = vst [vmem:[#allocation1 + $0x5] ss:$9 sm:$0xff] %v1039_v32  ;;  %v765_v50 = vsel %vm747_vm1, %v732_v26, %v481_v11 }
 0x155   : > { %1213 = vst [vmem:[#allocation1 + $0x6] ss:$9 sm:$0xff] %v1040_v6  ;;  %v798_v52 = vsel %vm780_vm3, %v765_v50, %v518_v36 }
 0x156   : > { %1215 = vst [vmem:[#allocation1 + $0x7] ss:$9 sm:$0xff] %v1041_v28 }
 0x158   : > { %677 = vrot.lane.b32.xlu2 %v539_v37, %s1979_s10 }
 0x159   : > { %638 = vrot.lane.b32.xlu1 %v1723_v47, %s1977_s8  ;;  %601 = vrot.lane.b32.xlu0 %v463_v42, %s1978_s9 }
 0x15a   : > { %v701_v33 = vpop.permute.xlu2 %700 }
 0x15b   : > { %v520_v27 = vpop.permute.xlu1 %519  ;;  %v557_v34 = vpop.permute.xlu0 %556 }
 0x15c   : > { %v831_v41 = vsel %vm813_vm4, %v798_v52, %v557_v34  ;;  %v800_v17 = vsel %vm780_vm3, %v767_v54, %v520_v27 }
 0x15d   : > { %v1216_v45 = vld [vmem:[#allocation1] sm:$0xff]  ;;  %v864_v25 = vsel %vm846_vm5, %v831_v41, %v2548_v8 }
 0x15e   : > { %1696 = vmatmul.msk.bf16.gmra.mxu1 %vm1343_vm9, %v1216_v45 }
 0x160   : > { %531 = vrot.lane.b32.xlu2 %v1723_v47, %s1975_s6  ;;  %s1819_s6 = smul.u32 112, %s175_s28 }
 0x161   : > { %494 = vrot.lane.b32.xlu1 %v463_v42, %s1974_s5  ;;  %710 = vrot.lane.b32.xlu0 %v572_v60, %s1980_s11 }
 0x162   : > { %v2591_v23 = vpop.permute.xlu2 %593 }
 0x163   : > { %v627_v18 = vpop.permute.xlu1 %626  ;;  %v559_v48 = vpop.permute.xlu0 %558 }
 0x164   : > { %v897_v39 = vsel %vm879_vm6, %v864_v25, %v627_v18  ;;  %v833_v42 = vsel %vm813_vm4, %v800_v17, %v559_v48 }
 0x165   : > { %v866_v57 = vsel %vm846_vm5, %v833_v42, %v2561_v63  ;;  %v736_v63 = vsel %vm714_vm0, %v1887_v49, %v2292_v30  ;;  %v2622_v30 = vld [vmem:[%s2774_s2] ss:$0 sm:$0xff] }
 0x168   : > { %640 = vrot.lane.b32.xlu2 %v1724_v40, %s1977_s8 }
 0x169   : > { %603 = vrot.lane.b32.xlu1 %v572_v60, %s1978_s9  ;;  %570 = vrot.lane.b32.xlu0 %v539_v37, %s1976_s7  ;;  %s2634_s7 = scalar_lea.vmem [#allocation2], %s1819_s6 }
 0x16a   : > { %v703_v1 = vpop.permute.xlu2 %702 }
 0x16b   : > { %v629_v38 = vpop.permute.xlu1 %628  ;;  %v666_v62 = vpop.permute.xlu0 %665 }
 0x16c   : > { %v930_v12 = vsel %vm912_vm7, %v897_v39, %v666_v62  ;;  %v899_v21 = vsel %vm879_vm6, %v866_v57, %v629_v38 }
 0x16d   : > { %v963_v2 = vsel %vm945_vm8, %v930_v12, %v699_v14 }
 0x16e   : > { %v1042_v8 = vrot.slane %v963_v2, 1  ;;  %v1043_v59 = vrot.slane %v963_v2, 2  ;;  %v1044_v15 = vrot.slane %v963_v2, 3  ;;  %1217 = vst [vmem:[#allocation1] ss:$9 sm:$0xff] %v963_v2  ;;  %v1045_v61 = vrot.slane %v963_v2, 4 }
 0x16f   : > { %v1046_v55 = vrot.slane %v963_v2, 5  ;;  %v1047_v44 = vrot.slane %v963_v2, 6 }
 0x170   : > { %1219 = vst [vmem:[#allocation1 + $0x1] ss:$9 sm:$0xff] %v1042_v8 }
 0x171   : > { %712 = vrot.lane.b32.xlu1 %v681_v4, %s1980_s11  ;;  %1221 = vst [vmem:[#allocation1 + $0x2] ss:$9 sm:$0xff] %v1043_v59  ;;  %679 = vrot.lane.b32.xlu0 %v648_v10, %s1979_s10  ;;  %s1526_s11 = sshll.u32 %s2634_s7, 4  ;;  %s1527_s11 = int_to_ptr.vmem [resolvable:$true] %s1526_s11 }
 0x172   : > { %1223 = vst [vmem:[#allocation1 + $0x3] ss:$9 sm:$0xff] %v1044_v15  ;;  %v563_v28 = vpop.permute.xlu2 %562 }
 0x173   : > { %v485_v51 = vpop.permute.xlu1 %484  ;;  %1225 = vst [vmem:[#allocation1 + $0x4] ss:$9 sm:$0xff] %v1045_v61  ;;  %v668_v46 = vpop.permute.xlu0 %667 }
 0x174   : > { %1227 = vst [vmem:[#allocation1 + $0x5] ss:$9 sm:$0xff] %v1046_v55  ;;  %v932_v19 = vsel %vm912_vm7, %v899_v21, %v668_v46  ;;  %v769_v24 = vsel %vm747_vm1, %v736_v63, %v485_v51 }
 0x175   : > { %1229 = vst [vmem:[#allocation1 + $0x6] ss:$9 sm:$0xff] %v1047_v44  ;;  %v965_v5 = vsel %vm945_vm8, %v932_v19, %v701_v33 }
 0x176   : > { %1230 = vst [vmem:[#allocation1 + $0x7] ss:$9 sm:$0xff] %v965_v5  ;;  %v1048_v29 = vrot.slane %v965_v5, 1  ;;  %v1049_v35 = vrot.slane %v965_v5, 2  ;;  %v1050_v36 = vrot.slane %v965_v5, 3  ;;  %v1051_v13 = vrot.slane %v965_v5, 4 }
 0x177   : > { %v1052_v56 = vrot.slane %v965_v5, 5  ;;  %v1053_v14 = vrot.slane %v965_v5, 6 }
 0x179   : > { %v1385_v47 = vpop.f32.mrf.mxu0 }
 0x17a   : > { %v1386_v27 = vadd.f32 %v2622_v30, %v1385_v47  ;;  %v672_v16 = vpop.permute.xlu2 %671  ;;  %v1889_v47 = vld [vmem:[%s2062_s30 + $0x60] sm:$0xff] }
 0x17b   : > { %v561_v22 = vpop.permute.xlu1 %560  ;;  %v522_v0 = vpop.permute.xlu0 %521  ;;  %v740_v49 = vsel %vm714_vm0, %v1889_v47, %v2311_v7 }
 0x17c   : > { %v802_v6 = vsel %vm780_vm3, %v769_v24, %v522_v0 }
 0x17d   : > { %v1231_v32 = vld [vmem:[#allocation1] sm:$0xff]  ;;  %v835_v11 = vsel %vm813_vm4, %v802_v6, %v561_v22 }
 0x17e   : > { %1233 = vst [vmem:[#allocation1] ss:$9 sm:$0xff] %v1048_v29  ;;  %1697 = vmatmul.msk.bf16.gmra.mxu1 %vm1343_vm9, %v1231_v32  ;;  %v868_v60 = vsel %vm846_vm5, %v835_v11, %v2591_v23  ;;  %v738_v23 = vsel %vm714_vm0, %v1888_v53, %v2263_v31 }
 0x17f   : > { %1235 = vst [vmem:[#allocation1 + $0x1] ss:$9 sm:$0xff] %v1049_v35 }
 0x180   : > { %1237 = vst [vmem:[#allocation1 + $0x2] ss:$9 sm:$0xff] %v1050_v36 }
 0x181   : > { %1239 = vst [vmem:[#allocation1 + $0x3] ss:$9 sm:$0xff] %v1051_v13  ;;  %v1387_v37 = vpop.f32.mrf.mxu0 }
 0x182   : > { %1241 = vst [vmem:[#allocation1 + $0x4] ss:$9 sm:$0xff] %v1052_v56  ;;  %v1388_v34 = vadd.f32 %v2622_v30, %v1387_v37  ;;  %v526_v4 = vpop.permute.xlu2 %525 }
 0x183   : > { %1243 = vst [vmem:[#allocation1 + $0x5] ss:$9 sm:$0xff] %v1053_v14  ;;  %v670_v45 = vpop.permute.xlu1 %669  ;;  %v631_v33 = vpop.permute.xlu0 %630 }
 0x184   : > { %v901_v40 = vsel %vm879_vm6, %v868_v60, %v631_v33  ;;  %v1730_v26 = vpack.c.bf16 %v1388_v34, %v1386_v27 }
 0x185   : > { %v934_v18 = vsel %vm912_vm7, %v901_v40, %v670_v45 }
 0x186   : > { %v967_v50 = vsel %vm945_vm8, %v934_v18, %v703_v1  ;;  %1731 = vst [vmem:[%s2634_s7] sm:$0xff] %v1730_v26  }
 0x187   : > { %v1054_v48 = vrot.slane %v967_v50, 1  ;;  %1244 = vst [vmem:[#allocation1 + $0x6] ss:$9 sm:$0xff] %v967_v50  ;;  %v1055_v38 = vrot.slane %v967_v50, 2  ;;  %v1056_v39 = vrot.slane %v967_v50, 3  ;;  %v1057_v20 = vrot.slane %v967_v50, 4 }
 0x188   : > { %v1058_v54 = vrot.slane %v967_v50, 5  ;;  %v1059_v10 = vrot.slane %v967_v50, 6 }
 0x189   : > { %1246 = vst [vmem:[#allocation1 + $0x7] ss:$9 sm:$0xff] %v1054_v48  ;;  %v1390_v52 = vpop.f32.mrf.mxu0 }
 0x18a   : > { %v1391_v31 = vadd.f32 %v2622_v30, %v1390_v52  ;;  %v635_v46 = vpop.permute.xlu2 %634  ;;  %v1890_v52 = vld [vmem:[%s2062_s30 + $0x68] sm:$0xff] }
 0x18b   : > { %v524_v41 = vpop.permute.xlu1 %523  ;;  %v487_v3 = vpop.permute.xlu0 %486 }
 0x18c   : > { %v771_v25 = vsel %vm747_vm1, %v738_v23, %v487_v3 }
 0x18d   : > { %v804_v12 = vsel %vm780_vm3, %v771_v25, %v524_v41  ;;  %v742_v41 = vsel %vm714_vm0, %v1890_v52, %v2306_v58 }
 0x18e   : > { %v837_v15 = vsel %vm813_vm4, %v804_v12, %v563_v28 }
 0x190   : > { %v1247_v62 = vld [vmem:[#allocation1] sm:$0xff] }
 0x191   : > { %1249 = vst [vmem:[#allocation1] ss:$9 sm:$0xff] %v1055_v38  ;;  %1698 = vmatmul.msk.bf16.vlgmr.msra.gmra.mxu2 %vm1343_vm9, %v1247_v62  ;;  %v1392_v2 = vpop.f32.mrf.mxu0 }
 0x192   : > { %1251 = vst [vmem:[#allocation1 + $0x1] ss:$9 sm:$0xff] %v1056_v39  ;;  %v1393_v17 = vadd.f32 %v2622_v30, %v1392_v2  ;;  %v491_v36 = vpop.permute.xlu2 %490 }
 0x193   : > { %1253 = vst [vmem:[#allocation1 + $0x2] ss:$9 sm:$0xff] %v1057_v20  ;;  %v633_v8 = vpop.permute.xlu1 %632  ;;  %v596_v59 = vpop.permute.xlu0 %595  ;;  %v775_v38 = vsel %vm747_vm1, %v742_v41, %v491_v36 }
 0x194   : > { %1255 = vst [vmem:[#allocation1 + $0x3] ss:$9 sm:$0xff] %v1058_v54  ;;  %v1735_v42 = vpack.c.bf16 %v1393_v17, %v1391_v31  ;;  %v870_v61 = vsel %vm846_vm5, %v837_v15, %v596_v59 }
 0x195   : > { %1257 = vst [vmem:[#allocation1 + $0x4] ss:$9 sm:$0xff] %v1059_v10  ;;  %v903_v55 = vsel %vm879_vm6, %v870_v61, %v633_v8 }
 0x196   : > { %1797 = vst [vmem:[%s2634_s7 + $0x8] sm:$0xff] %v1735_v42   ;;  %v936_v51 = vsel %vm912_vm7, %v903_v55, %v672_v16 }
 0x199   : > { %v1395_v44 = vpop.f32.mrf.mxu0 }
 0x19a   : > { %v1396_v0 = vadd.f32 %v2622_v30, %v1395_v44  ;;  %v600_v48 = vpop.permute.xlu2 %599 }
 0x19b   : > { %v489_v57 = vpop.permute.xlu1 %488  ;;  %v705_v21 = vpop.permute.xlu0 %704 }
 0x19c   : > { %v969_v1 = vsel %vm945_vm8, %v936_v51, %v705_v21  ;;  %v773_v63 = vsel %vm747_vm1, %v740_v49, %v489_v57  ;;  %v1891_v49 = vld [vmem:[%s2062_s30 + $0x70] sm:$0xff] }
 0x19d   : > { %v1060_v19 = vrot.slane %v969_v1, 1  ;;  %v1061_v5 = vrot.slane %v969_v1, 2  ;;  %1258 = vst [vmem:[#allocation1 + $0x5] ss:$9 sm:$0xff] %v969_v1  ;;  %v806_v32 = vsel %vm780_vm3, %v773_v63, %v526_v4  ;;  %v1062_v13 = vrot.slane %v969_v1, 3 }
 0x19e   : > { %v1063_v56 = vrot.slane %v969_v1, 4  ;;  %v1064_v7 = vrot.slane %v969_v1, 5  ;;  %v1065_v37 = vrot.slane %v969_v1, 6  ;;  %v744_v63 = vsel %vm714_vm0, %v1891_v49, %v2274_v43 }
 0x19f   : > { %1260 = vst [vmem:[#allocation1 + $0x6] ss:$9 sm:$0xff] %v1060_v19 }
 0x1a0   : > { %1262 = vst [vmem:[#allocation1 + $0x7] ss:$9 sm:$0xff] %v1061_v5 }
 0x1a1   : > { %v1397_v22 = vpop.f32.mrf.mxu0 }
 0x1a2   : > { %v1398_v24 = vadd.f32 %v2622_v30, %v1397_v22  ;;  %v709_v4 = vpop.permute.xlu2 %708 }
 0x1a3   : > { %v598_v29 = vpop.permute.xlu1 %597  ;;  %v565_v35 = vpop.permute.xlu0 %564 }
 0x1a4   : > { %v1740_v6 = vpack.c.bf16 %v1398_v24, %v1396_v0  ;;  %v839_v28 = vsel %vm813_vm4, %v806_v32, %v565_v35 }
 0x1a5   : > { %v872_v14 = vsel %vm846_vm5, %v839_v28, %v598_v29 }
 0x1a6   : > { %1798 = vst [vmem:[%s2634_s7 + $0x10] sm:$0xff] %v1740_v6   ;;  %v905_v45 = vsel %vm879_vm6, %v872_v14, %v635_v46 }
 0x1a7   : > { %v1263_v11 = vld [vmem:[#allocation1] sm:$0xff] }
 0x1a8   : > { %1265 = vst [vmem:[#allocation1] ss:$9 sm:$0xff] %v1062_v13  ;;  %1699 = vmatmul.msk.bf16.gmra.mxu2 %vm1343_vm9, %v1263_v11 }
 0x1a9   : > { %1267 = vst [vmem:[#allocation1 + $0x1] ss:$9 sm:$0xff] %v1063_v56  ;;  %v1400_v27 = vpop.f32.mrf.mxu0 }
 0x1aa   : > { %1269 = vst [vmem:[#allocation1 + $0x2] ss:$9 sm:$0xff] %v1064_v7  ;;  %v1401_v3 = vadd.f32 %v2622_v30, %v1400_v27  ;;  %v569_v1 = vpop.permute.xlu2 %568 }
 0x1ab   : > { %1271 = vst [vmem:[#allocation1 + $0x3] ss:$9 sm:$0xff] %v1065_v37  ;;  %v707_v34 = vpop.permute.xlu1 %706  ;;  %v674_v60 = vpop.permute.xlu0 %673 }
 0x1ac   : > { %v938_v33 = vsel %vm912_vm7, %v905_v45, %v674_v60 }
 0x1ad   : > { %v971_v40 = vsel %vm945_vm8, %v938_v33, %v707_v34 }
 0x1ae   : > { %v1066_v26 = vrot.slane %v971_v40, 1  ;;  %v1067_v18 = vrot.slane %v971_v40, 2  ;;  %v1068_v50 = vrot.slane %v971_v40, 3  ;;  %1272 = vst [vmem:[#allocation1 + $0x4] ss:$9 sm:$0xff] %v971_v40  ;;  %v1069_v20 = vrot.slane %v971_v40, 4 }
 0x1af   : > { %v1070_v54 = vrot.slane %v971_v40, 5  ;;  %v1071_v58 = vrot.slane %v971_v40, 6 }
 0x1b0   : > { %1274 = vst [vmem:[#allocation1 + $0x5] ss:$9 sm:$0xff] %v1066_v26 }
 0x1b1   : > { %1276 = vst [vmem:[#allocation1 + $0x6] ss:$9 sm:$0xff] %v1067_v18  ;;  %v1402_v16 = vpop.f32.mrf.mxu0 }
 0x1b2   : > { %1278 = vst [vmem:[#allocation1 + $0x7] ss:$9 sm:$0xff] %v1068_v50  ;;  %v1403_v53 = vadd.f32 %v2622_v30, %v1402_v16  ;;  %v678_v13 = vpop.permute.xlu2 %677 }
 0x1b3   : > { %v567_v23 = vpop.permute.xlu1 %566  ;;  %v528_v25 = vpop.permute.xlu0 %527 }
 0x1b4   : > { %v1745_v39 = vpack.c.bf16 %v1403_v53, %v1401_v3  ;;  %v808_v62 = vsel %vm780_vm3, %v775_v38, %v528_v25 }
 0x1b5   : > { %v841_v12 = vsel %vm813_vm4, %v808_v62, %v567_v23 }
 0x1b6   : > { %1799 = vst [vmem:[%s2634_s7 + $0x18] sm:$0xff] %v1745_v39   ;;  %v874_v31 = vsel %vm846_vm5, %v841_v12, %v600_v48  ;;  %v1892_v48 = vld [vmem:[%s2062_s30 + $0x78] sm:$0xff]  ;;  %s1821_s30 = smul.u32 112, %s1963_s15 }
 0x1b7   : > { %v746_v16 = vsel %vm714_vm0, %v1892_v48, %v2321_v9 }
 0x1b8   : > { %s1525_s10 = scalar_lea.hbm %s2775_s3, %s1821_s30 }
 0x1b9   : > { %v1279_v2 = vld [vmem:[#allocation1] sm:$0xff]  ;;  %v1405_v10 = vpop.f32.mrf.mxu1  ;;  %s1528_s18 = sshll.u32 %s1525_s10, 4  ;;  %s1529_s18 = int_to_ptr.hbm [resolvable:$true] %s1528_s18 }
 0x1ba   : > { %1281 = vst [vmem:[#allocation1] ss:$9 sm:$0xff] %v1069_v20  ;;  %1700 = vmatmul.msk.bf16.gmra.mxu2 %vm1343_vm9, %v1279_v2  ;;  %v1406_v21 = vadd.f32 %v2622_v30, %v1405_v10  ;;  %v532_v18 = vpop.permute.xlu2 %531  ;;  %s1907_s21 = sshra.s32 %s1529_s18, 4  ;;  %s1908_s21 = int_to_ptr.hbm [resolvable:$true] %s1907_s21 }
 0x1bb   : > { %1283 = vst [vmem:[#allocation1 + $0x1] ss:$9 sm:$0xff] %v1070_v54  ;;  %v676_v17 = vpop.permute.xlu1 %675  ;;  %v637_v8 = vpop.permute.xlu0 %636  ;;  %s1909_s15 = scalar_lea.hbm %s1908_s21, 112  ;;  %p1914_p1 = scmp.lt.s32.totalorder %s1908_s21, %s2775_s3 }
 0x1bc   : > { %1285 = vst [vmem:[#allocation1 + $0x2] ss:$9 sm:$0xff] %v1071_v58  ;;  %v907_v59 = vsel %vm879_vm6, %v874_v31, %v637_v8  ;;  %p1910_p12 = scmp.ne.s32.totalorder %s1908_s21, %s1909_s15  ;;  %p1915_p2 = scmp.lt.s32.totalorder %s1913_s27, %s1909_s15 }
 0x1bd   : > { %v940_v15 = vsel %vm912_vm7, %v907_v59, %v676_v17 }
 0x1be   : > { %v973_v42 = vsel %vm945_vm8, %v940_v15, %v709_v4  ;;  %p1911_p13 = pnand %p1910_p12, %p2042_p4  ;;  %p1916_p3 = por %p1915_p2, %p1914_p1 }
 0x1bf   : > { %v1072_v61 = vrot.slane %v973_v42, 1  ;;  %v1073_v55 = vrot.slane %v973_v42, 2  ;;  %v1074_v44 = vrot.slane %v973_v42, 3  ;;  %1286 = vst [vmem:[#allocation1 + $0x3] ss:$9 sm:$0xff] %v973_v42  ;;  %v1075_v57 = vrot.slane %v973_v42, 4 }
 0x1c0   : > { %v1076_v24 = vrot.slane %v973_v42, 5  ;;  %v1077_v35 = vrot.slane %v973_v42, 6  ;;  %p1912_p0 = pneg %p1911_p13 }
 0x1c1   : > { %1288 = vst [vmem:[#allocation1 + $0x4] ss:$9 sm:$0xff] %v1072_v61  ;;  %v1407_v51 = vpop.f32.mrf.mxu1 }
 0x1c2   : > { %1290 = vst [vmem:[#allocation1 + $0x5] ss:$9 sm:$0xff] %v1073_v55  ;;  %v1408_v46 = vadd.f32 %v2622_v30, %v1407_v51  ;;  %v641_v62 = vpop.permute.xlu2 %640  ;;  %p1917_p5 = pnand %p1916_p3, %p1912_p0 }
 0x1c3   : > { %1292 = vst [vmem:[#allocation1 + $0x6] ss:$9 sm:$0xff] %v1074_v44  ;;  %v530_v19 = vpop.permute.xlu1 %529  ;;  %v493_v5 = vpop.permute.xlu0 %492 }
 0x1c4   : > { %1294 = vst [vmem:[#allocation1 + $0x7] ss:$9 sm:$0xff] %v1075_v57  ;;  %v1750_v47 = vpack.c.bf16 %v1408_v46, %v1406_v21  ;;  %v777_v22 = vsel %vm747_vm1, %v744_v63, %v493_v5 }
 0x1c5   : > { %v810_v0 = vsel %vm780_vm3, %v777_v22, %v530_v19 }
 0x1c6   : > { %1800 = vst [vmem:[%s2634_s7 + $0x20] sm:$0xff] %v1750_v47   ;;  %v843_v36 = vsel %vm813_vm4, %v810_v0, %v569_v1 }
 0x1ca   : > { %v1410_v29 = vpop.f32.mrf.mxu1 }
 0x1cb   : > { %v1295_v32 = vld [vmem:[#allocation1] sm:$0xff]  ;;  %v639_v6 = vpop.permute.xlu1 %638  ;;  %v602_v28 = vpop.permute.xlu0 %601  ;;  %v1411_v7 = vadd.f32 %v2622_v30, %v1410_v29 }
 0x1cc   : > { %1701 = vmatmul.msk.bf16.gmra.mxu2 %vm1343_vm9, %v1295_v32  ;;  %1297 = vst [vmem:[#allocation1] ss:$9 sm:$0xff] %v1076_v24  ;;  %v876_v43 = vsel %vm846_vm5, %v843_v36, %v602_v28 }
 0x1cd   : > { %1299 = vst [vmem:[#allocation1 + $0x1] ss:$9 sm:$0xff] %v1077_v35  ;;  %v909_v56 = vsel %vm879_vm6, %v876_v43, %v639_v6 }
 0x1ce   : > { %v942_v14 = vsel %vm912_vm7, %v909_v56, %v678_v13 }
 0x1d2   : > { %v1412_v11 = vpop.f32.mrf.mxu1 }
 0x1d3   : > { %v1413_v37 = vadd.f32 %v2622_v30, %v1412_v11  ;;  %v495_v27 = vpop.permute.xlu1 %494  ;;  %v711_v34 = vpop.permute.xlu0 %710 }
 0x1d4   : > { %v975_v45 = vsel %vm945_vm8, %v942_v14, %v711_v34  ;;  %v779_v41 = vsel %vm747_vm1, %v746_v16, %v495_v27 }
 0x1d5   : > { %v1755_v60 = vpack.c.bf16 %v1413_v37, %v1411_v7  ;;  %v1078_v33 = vrot.slane %v975_v45, 1  ;;  %v1079_v40 = vrot.slane %v975_v45, 2  ;;  %1300 = vst [vmem:[#allocation1 + $0x2] ss:$9 sm:$0xff] %v975_v45  ;;  %v1080_v26 = vrot.slane %v975_v45, 3 }
 0x1d6   : > { %v1081_v50 = vrot.slane %v975_v45, 4  ;;  %v1082_v52 = vrot.slane %v975_v45, 5  ;;  %v812_v23 = vsel %vm780_vm3, %v779_v41, %v532_v18  ;;  %v1083_v20 = vrot.slane %v975_v45, 6 }
 0x1d7   : > { %1801 = vst [vmem:[%s2634_s7 + $0x28] sm:$0xff] %v1755_v60  }
 0x1d8   : > { %1302 = vst [vmem:[#allocation1 + $0x3] ss:$9 sm:$0xff] %v1078_v33 }
 0x1d9   : > { %1304 = vst [vmem:[#allocation1 + $0x4] ss:$9 sm:$0xff] %v1079_v40 }
 0x1da   : > { %1306 = vst [vmem:[#allocation1 + $0x5] ss:$9 sm:$0xff] %v1080_v26 }
 0x1db   : > { %1308 = vst [vmem:[#allocation1 + $0x6] ss:$9 sm:$0xff] %v1081_v50  ;;  %v1415_v3 = vpop.f32.mrf.mxu1  ;;  %v571_v53 = vpop.permute.xlu0 %570 }
 0x1dc   : > { %1310 = vst [vmem:[#allocation1 + $0x7] ss:$9 sm:$0xff] %v1082_v52  ;;  %v604_v25 = vpop.permute.xlu1 %603  ;;  %v845_v38 = vsel %vm813_vm4, %v812_v23, %v571_v53  ;;  %v1416_v2 = vadd.f32 %v2622_v30, %v1415_v3 }
 0x1dd   : > { %v878_v39 = vsel %vm846_vm5, %v845_v38, %v604_v25 }
 0x1de   : > { %v911_v9 = vsel %vm879_vm6, %v878_v39, %v641_v62 }
 0x1e3   : > { %v1417_v12 = vpop.f32.mrf.mxu1  ;;  %v1311_v4 = vld [vmem:[#allocation1] sm:$0xff]  ;;  %v680_v54 = vpop.permute.xlu0 %679 }
 0x1e4   : > { %v1418_v10 = vadd.f32 %v2622_v30, %v1417_v12  ;;  %1702 = vmatmul.msk.bf16.vlgmr.msra.gmra.mxu3 %vm1343_vm9, %v1311_v4  ;;  %1313 = vst [vmem:[#allocation1] ss:$9 sm:$0xff] %v1083_v20  ;;  %v944_v58 = vsel %vm912_vm7, %v911_v9, %v680_v54  ;;  %v713_v31 = vpop.permute.xlu1 %712 }
 0x1e5   : > { %v977_v17 = vsel %vm945_vm8, %v944_v58, %v713_v31 }
 0x1e6   : > { %v1760_v8 = vpack.c.bf16 %v1418_v10, %v1416_v2  ;;  %v1084_v59 = vrot.slane %v977_v17, 1  ;;  %v1085_v15 = vrot.slane %v977_v17, 2  ;;  %1314 = vst [vmem:[#allocation1 + $0x1] ss:$9 sm:$0xff] %v977_v17  ;;  %v1086_v42 = vrot.slane %v977_v17, 3 }
 0x1e7   : > { %v1087_v61 = vrot.slane %v977_v17, 4  ;;  %v1088_v55 = vrot.slane %v977_v17, 5  ;;  %v1089_v44 = vrot.slane %v977_v17, 6 }
 0x1e8   : > { %1802 = vst [vmem:[%s2634_s7 + $0x30] sm:$0xff] %v1760_v8  }
 0x1e9   : > { %1316 = vst [vmem:[#allocation1 + $0x2] ss:$9 sm:$0xff] %v1084_v59 }
 0x1ea   : > { %1318 = vst [vmem:[#allocation1 + $0x3] ss:$9 sm:$0xff] %v1085_v15 }
 0x1eb   : > { %1320 = vst [vmem:[#allocation1 + $0x4] ss:$9 sm:$0xff] %v1086_v42 }
 0x1ec   : > { %1322 = vst [vmem:[#allocation1 + $0x5] ss:$9 sm:$0xff] %v1087_v61 }
 0x1ed   : > { %1324 = vst [vmem:[#allocation1 + $0x6] ss:$9 sm:$0xff] %v1088_v55 }
 0x1ee   : > { %1326 = vst [vmem:[#allocation1 + $0x7] ss:$9 sm:$0xff] %v1089_v44 }
 0x1f5   : > { %v1327_v57 = vld [vmem:[#allocation1] sm:$0xff] }
 0x1f6   : > { %1703 = vmatmul.msk.bf16.gmra.mxu3 %vm1343_vm9, %v1327_v57 }
 0x1fb   : > { %v1420_v51 = vpop.f32.mrf.mxu1 }
 0x1fc   : > { %v1421_v46 = vadd.f32 %v2622_v30, %v1420_v51 }
 0x203   : > { %v1422_v21 = vpop.f32.mrf.mxu1 }
 0x204   : > { %v1423_v1 = vadd.f32 %v2622_v30, %v1422_v21 }
 0x206   : > { %v1765_v19 = vpack.c.bf16 %v1423_v1, %v1421_v46 }
 0x208   : > { %1803 = vst [vmem:[%s2634_s7 + $0x38] sm:$0xff] %v1765_v19  }
 0x214   : > { %v1425_v5 = vpop.f32.mrf.mxu2 }
 0x215   : > { %v1426_v49 = vadd.f32 %v2622_v30, %v1425_v5 }
 0x21c   : > { %v1427_v47 = vpop.f32.mrf.mxu2 }
 0x21d   : > { %v1428_v63 = vadd.f32 %v2622_v30, %v1427_v47 }
 0x21f   : > { %v1770_v22 = vpack.c.bf16 %v1428_v63, %v1426_v49 }
 0x221   : > { %1804 = vst [vmem:[%s2634_s7 + $0x40] sm:$0xff] %v1770_v22  }
 0x22b   : > { %v1430_v0 = vpop.f32.mrf.mxu2 }
 0x22c   : > { %v1431_v29 = vadd.f32 %v2622_v30, %v1430_v0 }
 0x233   : > { %v1432_v24 = vpop.f32.mrf.mxu2 }
 0x234   : > { %v1433_v35 = vadd.f32 %v2622_v30, %v1432_v24 }
 0x236   : > { %v1775_v32 = vpack.c.bf16 %v1433_v35, %v1431_v29 }
 0x238   : > { %1805 = vst [vmem:[%s2634_s7 + $0x48] sm:$0xff] %v1775_v32  }
 0x23d   : > { %v1435_v6 = vpop.f32.mrf.mxu2 }
 0x23e   : > { %v1436_v36 = vadd.f32 %v2622_v30, %v1435_v6 }
 0x245   : > { %v1437_v28 = vpop.f32.mrf.mxu2 }
 0x246   : > { %v1438_v13 = vadd.f32 %v2622_v30, %v1437_v28 }
 0x248   : > { %v1780_v43 = vpack.c.bf16 %v1438_v13, %v1436_v36 }
 0x24a   : > { %1806 = vst [vmem:[%s2634_s7 + $0x50] sm:$0xff] %v1780_v43  }
 0x24f   : > { %v1440_v56 = vpop.f32.mrf.mxu2 }
 0x250   : > { %v1441_v7 = vadd.f32 %v2622_v30, %v1440_v56 }
 0x257   : > { %v1442_v11 = vpop.f32.mrf.mxu2 }
 0x258   : > { %v1443_v14 = vadd.f32 %v2622_v30, %v1442_v11 }
 0x25a   : > { %v1785_v37 = vpack.c.bf16 %v1443_v14, %v1441_v7 }
 0x25c   : > { %1807 = vst [vmem:[%s2634_s7 + $0x58] sm:$0xff] %v1785_v37  }
 0x267   : > { %v1445_v27 = vpop.f32.mrf.mxu3 }
 0x268   : > { %v1446_v45 = vadd.f32 %v2622_v30, %v1445_v27 }
 0x26f   : > { %v1447_v34 = vpop.f32.mrf.mxu3 }
 0x270   : > { %v1448_v60 = vadd.f32 %v2622_v30, %v1447_v34 }
 0x272   : > { %v1790_v33 = vpack.c.bf16 %v1448_v60, %v1446_v45 }
 0x274   : > { %1808 = vst [vmem:[%s2634_s7 + $0x60] sm:$0xff] %v1790_v33  }
 0x279   : > { %v1450_v40 = vpop.f32.mrf.mxu3 }
 0x27a   : > { %v1451_v18 = vadd.f32 %v2622_v30, %v1450_v40 }
 0x281   : > { %v1452_v26 = vpop.f32.mrf.mxu3 }
 0x282   : > { %v1453_v50 = vadd.f32 %v2622_v30, %v1452_v26 }
 0x284   : > { %v1795_v48 = vpack.c.bf16 %v1453_v50, %v1451_v18 }
 0x286   : > { %1809 = vst [vmem:[%s2634_s7 + $0x68] sm:$0xff] %v1795_v48  }
 0x287   : > { %1920 = shalt.err (!%p1917_p5)
}
 0x288   : > { %s1981_s28 = smov 64  }
 0x289   : > { %1822 = dma.vmem_to_hbm [thread:$0]  (%p2042_p4), %s1527_s11, 1792, %s1529_s18, %s1512_s19, %s1981_s28, %s1981_s28, %s1973_s4  }
 0x28a PF: > { %p1828_p6 = scmp.ge.s32.totalorder %s1971_s17, 2  ;;  %s1543_s6 = sand.u32 1, %s1951_s12  }
 0x28b   : > { %s1544_s7 = scalar_lea.sflag [#allocation3], %s1543_s6 }
 0x28c   : > { %p1825_p7 = pnand %p1828_p6, %p2049_p8 }
 0x28e   : > { %p1826_p9 = pneg %p1825_p7 }
 0x290   : > { %1946 = dma.done.wait (%p1826_p9), %s1544_s7, 1792  }
 0x291   : > { %1948 = vsyncadd (%p1826_p9), %s1544_s7, 4294965504  ;;  %s16_s17 = sadd.s32 1, %s1971_s17   ;;  %s2778_s12 = smov %s1955_s13 }
 0x292   : > { %p13_p10 = scmp.ge.s32.totalorder %s16_s17, 4   ;;  %s2779_s13 = smov %s1959_s14 }
 0x293   : > { %s2780_s14 = smov %s2055_s25  ;;  %s2781_s15 = smov %s1967_s16 }
 0x294   : > { %s2782_s16 = smov %s2784_s20  ;;  %15 = sbr.rel (!%p13_p10) target bundleno = 4 (0x4), region = 75 }
 0x299   :  { %1550 = vsyncpa [#allocation3], 1 }
 0x29a   :  { %1552 = vsyncpa [#allocation3 + $0x1], 1 }

</bundles_post_ra>
